<compile_context>
chip_gen: v7x
topology: tpu7x:2x2x1
jax: 0.10.0
libtpu: 0.0.40
codegen_flags: <defaults>
</compile_context>

<pallas_src>
import functools
import math

import jax
import jax.numpy as jnp
from jax import lax
from jax.experimental import pallas as pl
from jax.experimental.pallas import tpu as pltpu


def _squish_softplus(v):
    # squishing_nonlin(softplus(v)) = sqrt(sqrt(softplus(v)))
    return jnp.sqrt(jnp.sqrt(jax.nn.softplus(v)))


def decoder_kernel(zT_ref, xT_ref, wz_ref, bz_ref, wx_ref, bx_ref,
                   woz_ref, wox_ref, bo_ref, out_ref, *, y_dim):
    # Feature-major: batch is the lane (last) axis, features are sublanes.
    # hz^T = Wz @ z^T + bz ; hx^T = Wx @ x^T + bx      -> (H, tb) each
    hz = (jnp.dot(wz_ref[...], zT_ref[...], preferred_element_type=jnp.float32)
          + bz_ref[...])
    hx = (jnp.dot(wx_ref[...], xT_ref[...], preferred_element_type=jnp.float32)
          + bx_ref[...])

    # hidden0/1/2 = squish(softplus(.)) applied three times.  Elementwise, so
    # applying it to the two halves of the (feature-)concatenated h separately
    # is exact.
    for _ in range(3):
        hz = _squish_softplus(hz)
        hx = _squish_softplus(hx)

    # Fused fc21/fc22 on the concatenated hidden state, with the concat folded
    # into a K-split:  [W21;W22] @ [hz2; hx2] = Wout[:, :H]@hz2 + Wout[:, H:]@hx2
    pre = (jnp.dot(woz_ref[...], hz, preferred_element_type=jnp.float32)
           + jnp.dot(wox_ref[...], hx, preferred_element_type=jnp.float32)
           + bo_ref[...])                                   # (2*y, tb)

    if y_dim % 8 == 0:
        # Sublane-aligned split: mu rows pass through, only sigma rows pay the
        # extra squish/softplus pass.
        out_ref[:y_dim, :] = pre[:y_dim, :]
        out_ref[y_dim:, :] = _squish_softplus(pre[y_dim:, :])
    else:
        # Fallback for unaligned y_dim: select per-row (pays 2x EUP on epilogue).
        row = lax.broadcasted_iota(jnp.int32, pre.shape, dimension=0)
        out_ref[...] = jnp.where(row < y_dim, pre, _squish_softplus(pre))


def _pick_tb(B):
    """Lane-axis batch tile: multiple of 128, >=2 grid steps when B allows,
    capped at 4096 lanes (blocks stay ~1-2 MiB, trivially within VMEM)."""
    n_lane_blocks = pl.cdiv(B, 128)
    if n_lane_blocks <= 1:
        return 128
    return min(pl.cdiv(n_lane_blocks, 2), 32) * 128


def decoder_forward(z, x, params, *, tb=None):
    """z: (B, z_dim), x: (B, x_dim). Returns (mu, sigma), each (B, y_dim)."""
    B, z_dim = z.shape
    x_dim = x.shape[1]
    H = params["wz"].shape[0]
    two_h = 2 * H
    two_y = params["b_out"].shape[0]
    y_dim = two_y // 2

    # Thin feature-major views of the activations (tiny HBM pass; bought back
    # many times over by lane-dense EUP work inside the kernel).
    zT = z.T.astype(jnp.float32)          # (z_dim, B)
    xT = x.T.astype(jnp.float32)          # (x_dim, B)

    if tb is None:
        tb = _pick_tb(B)
    grid = (pl.cdiv(B, tb),)

    kernel = functools.partial(decoder_kernel, y_dim=y_dim)

    # Advisory cost hint: transcendental-heavy, not FLOP-heavy.
    flops = 2 * B * (z_dim + x_dim) * H + 2 * B * two_h * two_y
    transcendentals = 12 * B * two_h + 4 * B * y_dim
    bytes_accessed = 4 * (zT.size + xT.size
                          + params["wz"].size + params["wx"].size
                          + params["wo_z"].size + params["wo_x"].size
                          + params["bz"].size + params["bx"].size
                          + params["b_out"].size
                          + B * two_y)

    outT = pl.pallas_call(
        kernel,
        out_shape=jax.ShapeDtypeStruct((two_y, B), jnp.float32),
        grid_spec=pltpu.PrefetchScalarGridSpec(
            num_scalar_prefetch=0,
            grid=grid,
            in_specs=[
                pl.BlockSpec((z_dim, tb), lambda i: (0, i)),   # z^T tile
                pl.BlockSpec((x_dim, tb), lambda i: (0, i)),   # x^T tile
                pl.BlockSpec((H, z_dim), lambda i: (0, 0)),    # Wz (resident)
                pl.BlockSpec((H, 1), lambda i: (0, 0)),        # bz
                pl.BlockSpec((H, x_dim), lambda i: (0, 0)),    # Wx
                pl.BlockSpec((H, 1), lambda i: (0, 0)),        # bx
                pl.BlockSpec((two_y, H), lambda i: (0, 0)),    # Wout[:, :H]
                pl.BlockSpec((two_y, H), lambda i: (0, 0)),    # Wout[:, H:]
                pl.BlockSpec((two_y, 1), lambda i: (0, 0)),    # b_out
            ],
            out_specs=pl.BlockSpec((two_y, tb), lambda i: (0, i)),
        ),
        compiler_params=pltpu.CompilerParams(
            dimension_semantics=("parallel",),
        ),
        cost_estimate=pl.CostEstimate(
            flops=flops,
            transcendentals=transcendentals,
            bytes_accessed=bytes_accessed,
        ),
    )(zT, xT,
      params["wz"], params["bz"], params["wx"], params["bx"],
      params["wo_z"], params["wo_x"], params["b_out"])

    mu = outT[:y_dim, :].T        # (B, y_dim)
    sigma = outT[y_dim:, :].T     # (B, y_dim)
    return mu, sigma


def xavier_uniform(key, out_dim, in_dim):
    # Matches torch.nn.init.xavier_uniform_ on a (out, in) Linear weight.
    a = math.sqrt(6.0 / (in_dim + out_dim))
    return jax.random.uniform(key, (out_dim, in_dim), jnp.float32, -a, a)


def make_params(key, z_dim, hidden_dim, y_dim, x_dim):
    H = hidden_dim
    ks = jax.random.split(key, 4)
    w_fcz = xavier_uniform(ks[0], H, z_dim)        # (H, z_dim)  torch layout
    w_fcx = xavier_uniform(ks[1], H, x_dim)        # (H, x_dim)
    w_fc21 = xavier_uniform(ks[2], y_dim, 2 * H)   # (y, 2H)
    w_fc22 = xavier_uniform(ks[3], y_dim, 2 * H)   # (y, 2H)

    # Fused output weight [fc21; fc22] -> (2y, 2H), split along K so the kernel
    # can consume the two hidden halves without materializing a concat.
    w_out = jnp.concatenate([w_fc21, w_fc22], axis=0)   # (2y, 2H)

    return {
        # Feature-major kernel params (torch (out, in) layout is already what
        # the transposed matmuls need).
        "wz": w_fcz, "bz": jnp.zeros((H, 1), jnp.float32),
        "wx": w_fcx, "bx": jnp.zeros((H, 1), jnp.float32),
        "wo_z": w_out[:, :H], "wo_x": w_out[:, H:],
        "b_out": jnp.zeros((2 * y_dim, 1), jnp.float32),
        # Raw torch-layout weights kept only for the plain-JAX reference.
        "raw": {"w_fcz": w_fcz, "w_fcx": w_fcx,
                "w_fc21": w_fc21, "w_fc22": w_fc22},
    }


def reference_forward(z, x, params):
    """Plain-JAX reference replicating the PyTorch forward exactly."""
    raw = params["raw"]
    f = lambda v: jnp.sqrt(jnp.sqrt(jax.nn.softplus(v)))
    hz = z @ raw["w_fcz"].T            # + 0 bias
    hx = x @ raw["w_fcx"].T            # + 0 bias
    h = jnp.concatenate([hz, hx], axis=1)
    h2 = f(f(f(h)))
    mu = h2 @ raw["w_fc21"].T          # + 0 bias
    sigma = f(h2 @ raw["w_fc22"].T)    # + 0 bias
    return mu, sigma


if __name__ == "__main__":
    # Small shapes consistent with the module: (B, z_dim), (B, x_dim).
    B, z_dim, hidden_dim, y_dim, x_dim = 8, 8, 32, 8, 16

    key = jax.random.PRNGKey(0)
    kp, kz, kx = jax.random.split(key, 3)
    params = make_params(kp, z_dim, hidden_dim, y_dim, x_dim)

    z = jax.random.normal(kz, (B, z_dim), jnp.float32)
    x = jax.random.normal(kx, (B, x_dim), jnp.float32)

    mu, sigma = decoder_forward(z, x, params)
    jax.block_until_ready((mu, sigma))

    mu_ref, sigma_ref = reference_forward(z, x, params)
    assert jnp.allclose(mu, mu_ref, atol=1e-5, rtol=1e-5)
    assert jnp.allclose(sigma, sigma_ref, atol=1e-5, rtol=1e-5)

    print("KERNEL_OK")
</pallas_src>

<mosaic_0001>
module attributes {stable_mosaic.version = 11 : i64} {
  func.func @decoder_kernel(%arg0: i32, %arg1: memref<8x128xf32, #tpu.memory_space<vmem>>, %arg2: memref<16x128xf32, #tpu.memory_space<vmem>>, %arg3: memref<32x8xf32, #tpu.memory_space<vmem>>, %arg4: memref<32x1xf32, #tpu.memory_space<vmem>>, %arg5: memref<32x16xf32, #tpu.memory_space<vmem>>, %arg6: memref<32x1xf32, #tpu.memory_space<vmem>>, %arg7: memref<16x32xf32, #tpu.memory_space<vmem>>, %arg8: memref<16x32xf32, #tpu.memory_space<vmem>>, %arg9: memref<16x1xf32, #tpu.memory_space<vmem>>, %arg10: memref<16x128xf32, #tpu.memory_space<vmem>>) attributes {dimension_semantics = [#tpu.dimension_semantics<parallel>], iteration_bounds = array<i64: 1>, scalar_prefetch = 0 : i64, scratch_operands = 0 : i64, tpu.core_type = #tpu.core_type<tc>, window_params = [{transform_indices = @transform_0, window_bounds = array<i64: 8, 128>}, {transform_indices = @transform_1, window_bounds = array<i64: 16, 128>}, {pipeline_mode = #tpu.pipeline_mode<synchronous>, transform_indices = @transform_2, window_bounds = array<i64: 32, 8>}, {pipeline_mode = #tpu.pipeline_mode<synchronous>, transform_indices = @transform_3, window_bounds = array<i64: 32, 1>}, {pipeline_mode = #tpu.pipeline_mode<synchronous>, transform_indices = @transform_4, window_bounds = array<i64: 32, 16>}, {pipeline_mode = #tpu.pipeline_mode<synchronous>, transform_indices = @transform_5, window_bounds = array<i64: 32, 1>}, {pipeline_mode = #tpu.pipeline_mode<synchronous>, transform_indices = @transform_6, window_bounds = array<i64: 16, 32>}, {pipeline_mode = #tpu.pipeline_mode<synchronous>, transform_indices = @transform_7, window_bounds = array<i64: 16, 32>}, {pipeline_mode = #tpu.pipeline_mode<synchronous>, transform_indices = @transform_8, window_bounds = array<i64: 16, 1>}, {transform_indices = @transform_9, window_bounds = array<i64: 16, 128>}]} {
    %c0 = arith.constant 0 : index
    %c0_0 = arith.constant 0 : index
    %0 = vector.load %arg3[%c0, %c0_0] : memref<32x8xf32, #tpu.memory_space<vmem>>, vector<32x8xf32>
    %c0_1 = arith.constant 0 : index
    %c0_2 = arith.constant 0 : index
    %1 = vector.load %arg1[%c0_1, %c0_2] : memref<8x128xf32, #tpu.memory_space<vmem>>, vector<8x128xf32>
    %cst = arith.constant dense<0.000000e+00> : vector<32x128xf32>
    %2 = tpu.matmul %0, %1, %cst {dimension_numbers = #tpu.dot_dimension_numbers<[1], [0], [0], [1], [0, 0, 1, 1], [], []>} : vector<32x8xf32>, vector<8x128xf32>, vector<32x128xf32> -> vector<32x128xf32>
    %c0_3 = arith.constant 0 : index
    %c0_4 = arith.constant 0 : index
    %3 = vector.load %arg4[%c0_3, %c0_4] : memref<32x1xf32, #tpu.memory_space<vmem>>, vector<32x1xf32>
    %4 = vector.broadcast %3 : vector<32x1xf32> to vector<32x128xf32>
    %5 = arith.addf %2, %4 : vector<32x128xf32>
    %c0_5 = arith.constant 0 : index
    %c0_6 = arith.constant 0 : index
    %6 = vector.load %arg5[%c0_5, %c0_6] : memref<32x16xf32, #tpu.memory_space<vmem>>, vector<32x16xf32>
    %c0_7 = arith.constant 0 : index
    %c0_8 = arith.constant 0 : index
    %7 = vector.load %arg2[%c0_7, %c0_8] : memref<16x128xf32, #tpu.memory_space<vmem>>, vector<16x128xf32>
    %cst_9 = arith.constant dense<0.000000e+00> : vector<32x128xf32>
    %8 = tpu.matmul %6, %7, %cst_9 {dimension_numbers = #tpu.dot_dimension_numbers<[1], [0], [0], [1], [0, 0, 1, 1], [], []>} : vector<32x16xf32>, vector<16x128xf32>, vector<32x128xf32> -> vector<32x128xf32>
    %c0_10 = arith.constant 0 : index
    %c0_11 = arith.constant 0 : index
    %9 = vector.load %arg6[%c0_10, %c0_11] : memref<32x1xf32, #tpu.memory_space<vmem>>, vector<32x1xf32>
    %10 = vector.broadcast %9 : vector<32x1xf32> to vector<32x128xf32>
    %11 = arith.addf %8, %10 : vector<32x128xf32>
    %cst_12 = arith.constant 0.000000e+00 : f32
    %12 = vector.broadcast %cst_12 : f32 to vector<32x128xf32>
    %13 = arith.maximumf %5, %12 : vector<32x128xf32>
    %14 = vector.broadcast %cst_12 : f32 to vector<32x128xf32>
    %15 = arith.subf %5, %14 : vector<32x128xf32>
    %16 = arith.cmpf one, %15, %15 : vector<32x128xf32>
    %17 = vector.broadcast %cst_12 : f32 to vector<32x128xf32>
    %18 = arith.addf %5, %17 : vector<32x128xf32>
    %19 = math.absf %15 : vector<32x128xf32>
    %cst_13 = arith.constant 0.000000e+00 : f32
    %20 = vector.broadcast %cst_13 : f32 to vector<32x128xf32>
    %21 = arith.subf %20, %19 : vector<32x128xf32>
    %22 = math.exp %21 : vector<32x128xf32>
    %23 = math.log1p %22 : vector<32x128xf32>
    %24 = arith.addf %13, %23 : vector<32x128xf32>
    %25 = arith.select %16, %18, %24 : vector<32x128xi1>, vector<32x128xf32>
    %26 = math.sqrt %25 : vector<32x128xf32>
    %27 = math.sqrt %26 : vector<32x128xf32>
    %cst_14 = arith.constant 0.000000e+00 : f32
    %28 = vector.broadcast %cst_14 : f32 to vector<32x128xf32>
    %29 = arith.maximumf %11, %28 : vector<32x128xf32>
    %30 = vector.broadcast %cst_14 : f32 to vector<32x128xf32>
    %31 = arith.subf %11, %30 : vector<32x128xf32>
    %32 = arith.cmpf one, %31, %31 : vector<32x128xf32>
    %33 = vector.broadcast %cst_14 : f32 to vector<32x128xf32>
    %34 = arith.addf %11, %33 : vector<32x128xf32>
    %35 = math.absf %31 : vector<32x128xf32>
    %cst_15 = arith.constant 0.000000e+00 : f32
    %36 = vector.broadcast %cst_15 : f32 to vector<32x128xf32>
    %37 = arith.subf %36, %35 : vector<32x128xf32>
    %38 = math.exp %37 : vector<32x128xf32>
    %39 = math.log1p %38 : vector<32x128xf32>
    %40 = arith.addf %29, %39 : vector<32x128xf32>
    %41 = arith.select %32, %34, %40 : vector<32x128xi1>, vector<32x128xf32>
    %42 = math.sqrt %41 : vector<32x128xf32>
    %43 = math.sqrt %42 : vector<32x128xf32>
    %cst_16 = arith.constant 0.000000e+00 : f32
    %44 = vector.broadcast %cst_16 : f32 to vector<32x128xf32>
    %45 = arith.maximumf %27, %44 : vector<32x128xf32>
    %46 = vector.broadcast %cst_16 : f32 to vector<32x128xf32>
    %47 = arith.subf %27, %46 : vector<32x128xf32>
    %48 = arith.cmpf one, %47, %47 : vector<32x128xf32>
    %49 = vector.broadcast %cst_16 : f32 to vector<32x128xf32>
    %50 = arith.addf %27, %49 : vector<32x128xf32>
    %51 = math.absf %47 : vector<32x128xf32>
    %cst_17 = arith.constant 0.000000e+00 : f32
    %52 = vector.broadcast %cst_17 : f32 to vector<32x128xf32>
    %53 = arith.subf %52, %51 : vector<32x128xf32>
    %54 = math.exp %53 : vector<32x128xf32>
    %55 = math.log1p %54 : vector<32x128xf32>
    %56 = arith.addf %45, %55 : vector<32x128xf32>
    %57 = arith.select %48, %50, %56 : vector<32x128xi1>, vector<32x128xf32>
    %58 = math.sqrt %57 : vector<32x128xf32>
    %59 = math.sqrt %58 : vector<32x128xf32>
    %cst_18 = arith.constant 0.000000e+00 : f32
    %60 = vector.broadcast %cst_18 : f32 to vector<32x128xf32>
    %61 = arith.maximumf %43, %60 : vector<32x128xf32>
    %62 = vector.broadcast %cst_18 : f32 to vector<32x128xf32>
    %63 = arith.subf %43, %62 : vector<32x128xf32>
    %64 = arith.cmpf one, %63, %63 : vector<32x128xf32>
    %65 = vector.broadcast %cst_18 : f32 to vector<32x128xf32>
    %66 = arith.addf %43, %65 : vector<32x128xf32>
    %67 = math.absf %63 : vector<32x128xf32>
    %cst_19 = arith.constant 0.000000e+00 : f32
    %68 = vector.broadcast %cst_19 : f32 to vector<32x128xf32>
    %69 = arith.subf %68, %67 : vector<32x128xf32>
    %70 = math.exp %69 : vector<32x128xf32>
    %71 = math.log1p %70 : vector<32x128xf32>
    %72 = arith.addf %61, %71 : vector<32x128xf32>
    %73 = arith.select %64, %66, %72 : vector<32x128xi1>, vector<32x128xf32>
    %74 = math.sqrt %73 : vector<32x128xf32>
    %75 = math.sqrt %74 : vector<32x128xf32>
    %cst_20 = arith.constant 0.000000e+00 : f32
    %76 = vector.broadcast %cst_20 : f32 to vector<32x128xf32>
    %77 = arith.maximumf %59, %76 : vector<32x128xf32>
    %78 = vector.broadcast %cst_20 : f32 to vector<32x128xf32>
    %79 = arith.subf %59, %78 : vector<32x128xf32>
    %80 = arith.cmpf one, %79, %79 : vector<32x128xf32>
    %81 = vector.broadcast %cst_20 : f32 to vector<32x128xf32>
    %82 = arith.addf %59, %81 : vector<32x128xf32>
    %83 = math.absf %79 : vector<32x128xf32>
    %cst_21 = arith.constant 0.000000e+00 : f32
    %84 = vector.broadcast %cst_21 : f32 to vector<32x128xf32>
    %85 = arith.subf %84, %83 : vector<32x128xf32>
    %86 = math.exp %85 : vector<32x128xf32>
    %87 = math.log1p %86 : vector<32x128xf32>
    %88 = arith.addf %77, %87 : vector<32x128xf32>
    %89 = arith.select %80, %82, %88 : vector<32x128xi1>, vector<32x128xf32>
    %90 = math.sqrt %89 : vector<32x128xf32>
    %91 = math.sqrt %90 : vector<32x128xf32>
    %cst_22 = arith.constant 0.000000e+00 : f32
    %92 = vector.broadcast %cst_22 : f32 to vector<32x128xf32>
    %93 = arith.maximumf %75, %92 : vector<32x128xf32>
    %94 = vector.broadcast %cst_22 : f32 to vector<32x128xf32>
    %95 = arith.subf %75, %94 : vector<32x128xf32>
    %96 = arith.cmpf one, %95, %95 : vector<32x128xf32>
    %97 = vector.broadcast %cst_22 : f32 to vector<32x128xf32>
    %98 = arith.addf %75, %97 : vector<32x128xf32>
    %99 = math.absf %95 : vector<32x128xf32>
    %cst_23 = arith.constant 0.000000e+00 : f32
    %100 = vector.broadcast %cst_23 : f32 to vector<32x128xf32>
    %101 = arith.subf %100, %99 : vector<32x128xf32>
    %102 = math.exp %101 : vector<32x128xf32>
    %103 = math.log1p %102 : vector<32x128xf32>
    %104 = arith.addf %93, %103 : vector<32x128xf32>
    %105 = arith.select %96, %98, %104 : vector<32x128xi1>, vector<32x128xf32>
    %106 = math.sqrt %105 : vector<32x128xf32>
    %107 = math.sqrt %106 : vector<32x128xf32>
    %c0_24 = arith.constant 0 : index
    %c0_25 = arith.constant 0 : index
    %108 = vector.load %arg7[%c0_24, %c0_25] : memref<16x32xf32, #tpu.memory_space<vmem>>, vector<16x32xf32>
    %cst_26 = arith.constant dense<0.000000e+00> : vector<16x128xf32>
    %109 = tpu.matmul %108, %91, %cst_26 {dimension_numbers = #tpu.dot_dimension_numbers<[1], [0], [0], [1], [0, 0, 1, 1], [], []>} : vector<16x32xf32>, vector<32x128xf32>, vector<16x128xf32> -> vector<16x128xf32>
    %c0_27 = arith.constant 0 : index
    %c0_28 = arith.constant 0 : index
    %110 = vector.load %arg8[%c0_27, %c0_28] : memref<16x32xf32, #tpu.memory_space<vmem>>, vector<16x32xf32>
    %cst_29 = arith.constant dense<0.000000e+00> : vector<16x128xf32>
    %111 = tpu.matmul %110, %107, %cst_29 {dimension_numbers = #tpu.dot_dimension_numbers<[1], [0], [0], [1], [0, 0, 1, 1], [], []>} : vector<16x32xf32>, vector<32x128xf32>, vector<16x128xf32> -> vector<16x128xf32>
    %112 = arith.addf %109, %111 : vector<16x128xf32>
    %c0_30 = arith.constant 0 : index
    %c0_31 = arith.constant 0 : index
    %113 = vector.load %arg9[%c0_30, %c0_31] : memref<16x1xf32, #tpu.memory_space<vmem>>, vector<16x1xf32>
    %114 = vector.broadcast %113 : vector<16x1xf32> to vector<16x128xf32>
    %115 = arith.addf %112, %114 : vector<16x128xf32>
    %116 = vector.extract_strided_slice %115 {offsets = [0, 0], sizes = [8, 128], strides = [1, 1]} : vector<16x128xf32> to vector<8x128xf32>
    %c0_32 = arith.constant 0 : index
    %c0_33 = arith.constant 0 : index
    %117 = vector.load %arg10[%c0_32, %c0_33] : memref<16x128xf32, #tpu.memory_space<vmem>>, vector<8x128xf32>
    tpu.vector_store %arg10[%c0_32, %c0_33], %116 {strides = array<i32>} : memref<16x128xf32, #tpu.memory_space<vmem>>, vector<8x128xf32>,
    %118 = vector.extract_strided_slice %115 {offsets = [8, 0], sizes = [8, 128], strides = [1, 1]} : vector<16x128xf32> to vector<8x128xf32>
    %cst_34 = arith.constant 0.000000e+00 : f32
    %119 = vector.broadcast %cst_34 : f32 to vector<8x128xf32>
    %120 = arith.maximumf %118, %119 : vector<8x128xf32>
    %121 = vector.broadcast %cst_34 : f32 to vector<8x128xf32>
    %122 = arith.subf %118, %121 : vector<8x128xf32>
    %123 = arith.cmpf one, %122, %122 : vector<8x128xf32>
    %124 = vector.broadcast %cst_34 : f32 to vector<8x128xf32>
    %125 = arith.addf %118, %124 : vector<8x128xf32>
    %126 = math.absf %122 : vector<8x128xf32>
    %cst_35 = arith.constant 0.000000e+00 : f32
    %127 = vector.broadcast %cst_35 : f32 to vector<8x128xf32>
    %128 = arith.subf %127, %126 : vector<8x128xf32>
    %129 = math.exp %128 : vector<8x128xf32>
    %130 = math.log1p %129 : vector<8x128xf32>
    %131 = arith.addf %120, %130 : vector<8x128xf32>
    %132 = arith.select %123, %125, %131 : vector<8x128xi1>, vector<8x128xf32>
    %133 = math.sqrt %132 : vector<8x128xf32>
    %134 = math.sqrt %133 : vector<8x128xf32>
    %c8 = arith.constant 8 : index
    %c0_36 = arith.constant 0 : index
    %135 = vector.load %arg10[%c8, %c0_36] : memref<16x128xf32, #tpu.memory_space<vmem>>, vector<8x128xf32>
    tpu.vector_store %arg10[%c8, %c0_36], %134 {strides = array<i32>} : memref<16x128xf32, #tpu.memory_space<vmem>>, vector<8x128xf32>,
    return
  }
  func.func @transform_0(%arg0: i32) -> (i32, i32) {
    %c0_i32 = arith.constant 0 : i32
    %c0_i32_0 = arith.constant 0 : i32
    return %c0_i32, %arg0 : i32, i32
  }
  func.func @transform_1(%arg0: i32) -> (i32, i32) {
    %c0_i32 = arith.constant 0 : i32
    %c0_i32_0 = arith.constant 0 : i32
    return %c0_i32, %arg0 : i32, i32
  }
  func.func @transform_2(%arg0: i32) -> (i32, i32) {
    %c0_i32 = arith.constant 0 : i32
    %c0_i32_0 = arith.constant 0 : i32
    %c0_i32_1 = arith.constant 0 : i32
    return %c0_i32, %c0_i32_0 : i32, i32
  }
  func.func @transform_3(%arg0: i32) -> (i32, i32) {
    %c0_i32 = arith.constant 0 : i32
    %c0_i32_0 = arith.constant 0 : i32
    %c0_i32_1 = arith.constant 0 : i32
    return %c0_i32, %c0_i32_0 : i32, i32
  }
  func.func @transform_4(%arg0: i32) -> (i32, i32) {
    %c0_i32 = arith.constant 0 : i32
    %c0_i32_0 = arith.constant 0 : i32
    %c0_i32_1 = arith.constant 0 : i32
    return %c0_i32, %c0_i32_0 : i32, i32
  }
  func.func @transform_5(%arg0: i32) -> (i32, i32) {
    %c0_i32 = arith.constant 0 : i32
    %c0_i32_0 = arith.constant 0 : i32
    %c0_i32_1 = arith.constant 0 : i32
    return %c0_i32, %c0_i32_0 : i32, i32
  }
  func.func @transform_6(%arg0: i32) -> (i32, i32) {
    %c0_i32 = arith.constant 0 : i32
    %c0_i32_0 = arith.constant 0 : i32
    %c0_i32_1 = arith.constant 0 : i32
    return %c0_i32, %c0_i32_0 : i32, i32
  }
  func.func @transform_7(%arg0: i32) -> (i32, i32) {
    %c0_i32 = arith.constant 0 : i32
    %c0_i32_0 = arith.constant 0 : i32
    %c0_i32_1 = arith.constant 0 : i32
    return %c0_i32, %c0_i32_0 : i32, i32
  }
  func.func @transform_8(%arg0: i32) -> (i32, i32) {
    %c0_i32 = arith.constant 0 : i32
    %c0_i32_0 = arith.constant 0 : i32
    %c0_i32_1 = arith.constant 0 : i32
    return %c0_i32, %c0_i32_0 : i32, i32
  }
  func.func @transform_9(%arg0: i32) -> (i32, i32) {
    %c0_i32 = arith.constant 0 : i32
    %c0_i32_0 = arith.constant 0 : i32
    return %c0_i32, %arg0 : i32, i32
  }
}

</mosaic_0001>

<bundles_post_ra>
// kernel: tpu_custom_call.1
= control target key start
LH: loop header
LB: loop body
LE: loop exit
PB: predicated region body
PF: predicated region fallthrough
CT: control target
= control target key end

     0   :  { %vm61_vm0 = vcmask 64512   ;;  %vm189_vm1 = vcmask 130048   ;;  %v1574_v3 = vmov 0   ;;  %s2327_s0 = inlined_call_operand.vmem [shape: f32[8,8], index: 0, kind: input, shape index: {}]   ;;  %s2328_s2 = inlined_call_operand.vmem [shape: f32[32,8], index: 2, kind: input, shape index: {}]   ;;  %s2329_s1 = inlined_call_operand.vmem [shape: f32[16,8], index: 1, kind: input, shape index: {}]   ;;  %s2330_s4 = inlined_call_operand.vmem [shape: f32[32,16], index: 4, kind: input, shape index: {}]   ;;  %s2331_s5 = inlined_call_operand.vmem [shape: f32[32,1], index: 5, kind: input, shape index: {}]   ;;  %s2332_s3 = inlined_call_operand.vmem [shape: f32[32,1], index: 3, kind: input, shape index: {}]   ;;  %s2333_s8 = inlined_call_operand.vmem [shape: f32[16,1], index: 8, kind: input, shape index: {}]   ;;  %s2334_s7 = inlined_call_operand.vmem [shape: f32[16,32], index: 7, kind: input, shape index: {}]   ;;  %s2335_s6 = inlined_call_operand.vmem [shape: f32[16,32], index: 6, kind: input, shape index: {}]   ;;  %s2336_s9 = inlined_call_operand.vmem [shape: f32[16,8], index: 9, kind: output, shape index: {}]  }
   0x1   :  { %v36_v0 = vld [vmem:[%s2327_s0] sm:$0xff]  ;;  %v33_v2 = vld [vmem:[%s2328_s2 + $0x8] sm:$0xff]  ;;  %1373 = vset.pattern.permute.xlu1 %v1574_v3  ;;  %1372 = vset.pattern.permute.xlu0 %v1574_v3  ;;  %v34_v6 = vld [vmem:[%s2328_s2 + $0x10] sm:$0xff] }
   0x2   :  { %v32_v1 = vld [vmem:[%s2328_s2] sm:$0xff]  ;;  %1309 = vmatprep.subr.mxu0 %v36_v0  ;;  %v164_v5 = vld [vmem:[%s2329_s1 + $0x8] sm:$0xff]  ;;  %v35_v10 = vld [vmem:[%s2328_s2 + $0x18] sm:$0xff] }
   0x3   :  { %1311 = vmatprep.mubr.msk.f32.mxu0 %vm61_vm0, %v32_v1  ;;  %v163_v4 = vld [vmem:[%s2329_s1] sm:$0xff]  ;;  %1310 = vmatpush3.msra.mxu0 %v36_v0  ;;  %v160_v12 = vld [vmem:[%s2330_s4 + $0x8] sm:$0xff]  ;;  %v161_v13 = vld [vmem:[%s2330_s4 + $0x10] sm:$0xff] }
   0x4   :  { %v1349_v7 = vpack.c.bf16 %v164_v5, %v163_v4  ;;  %v159_v8 = vld [vmem:[%s2330_s4] sm:$0xff]  ;;  %1312 = vmatmul.mubr.msk.f32.vlgmr.msra.gmra.mrb[0].mxu0 %vm61_vm0, %v33_v2  ;;  %v166_v14 = vld [vmem:[%s2331_s5 + $0x8] sm:$0xff]  ;;  %v162_v16 = vld [vmem:[%s2330_s4 + $0x18] sm:$0xff] }
   0x5   :  { %1321 = vmatprep.mubr.msk.f32.mxu1 %vm189_vm1, %v159_v8  ;;  %v165_v9 = vld [vmem:[%s2331_s5] sm:$0xff]  ;;  %1314 = vmatprep.mubr.msk.f32.mxu0 %vm61_vm0, %v34_v6  ;;  %v38_v15 = vld [vmem:[%s2332_s3 + $0x8] sm:$0xff]  ;;  %v40_v17 = vld [vmem:[%s2332_s3 + $0x18] sm:$0xff] }
   0x6   :  { %1350 = vmatprep.subr.bf16.mxu1 %v1349_v7  ;;  %v37_v11 = vld [vmem:[%s2332_s3] sm:$0xff]  ;;  %171 = vperm.xlu1 %1373, %v165_v9   ;;  %v39_v18 = vld [vmem:[%s2332_s3 + $0x10] sm:$0xff]  ;;  %v168_v19 = vld [vmem:[%s2331_s5 + $0x18] sm:$0xff] }
   0x7   :  { %1352 = vmatpush3.bf16.msra.mxu1 %v1349_v7  ;;  %43 = vperm.xlu0 %1372, %v37_v11   ;;  %v167_v20 = vld [vmem:[%s2331_s5 + $0x10] sm:$0xff]  ;;  %v1222_v21 = vld [vmem:[%s2333_s8] sm:$0xff]  ;;  %v1223_v22 = vld [vmem:[%s2333_s8 + $0x8] sm:$0xff] }
   0x8   :  { %1315 = vmatmul.mubr.msk.f32.gmra.mrb[2].mxu0 %vm61_vm0, %v35_v10 }
   0xa   :  { %1322 = vmatmul.mubr.msk.f32.vlgmr.msra.gmra.mrb[0].mxu1 %vm189_vm1, %v160_v12  ;;  %176 = vperm.xlu1 %1373, %v166_v14  }
   0xb   :  { %1324 = vmatprep.mubr.msk.f32.mxu1 %vm189_vm1, %v161_v13  ;;  %48 = vperm.xlu0 %1372, %v38_v15  }
   0xe   :  { %1325 = vmatmul.mubr.msk.f32.gmra.mrb[2].mxu1 %vm189_vm1, %v162_v16  ;;  %58 = vperm.xlu1 %1373, %v40_v17  }
   0xf   :  { %53 = vperm.xlu0 %1372, %v39_v18  }
  0x12   :  { %186 = vperm.xlu1 %1373, %v168_v19  }
  0x13   :  { %181 = vperm.xlu0 %1372, %v167_v20  }
  0x16   :  { %1226 = vperm.xlu1 %1373, %v1222_v21  }
  0x17   :  { %1231 = vperm.xlu0 %1372, %v1223_v22  }
  0x85   :  { %v172_v23 = vpop.permute.xlu1 %171 }
  0x86   :  { %v44_v24 = vpop.permute.xlu0 %43 }
  0x89   :  { %v177_v25 = vpop.permute.xlu1 %176 }
  0x8a   :  { %v49_v26 = vpop.permute.xlu0 %48 }
  0x8d   :  { %v59_v31 = vpop.permute.xlu1 %58 }
  0x8e   :  { %v54_v33 = vpop.permute.xlu0 %53 }
  0x91   :  { %v187_v48 = vpop.permute.xlu1 %186 }
  0x92   :  { %v182_v51 = vpop.permute.xlu0 %181 }
  0xd7   :  { %v1313_v27 = vpop.f32.mrb[0].mxu0 }
  0xd8   :  { %v1696_v28 = vadd.f32 %v1313_v27, %v49_v26  ;;  %v140_v29 = vpop.f32.mrb[1].mxu0 }
  0xd9   :  { %v1698_v30 = vadd.f32 %v140_v29, %v44_v24 }
  0xda   :  { %v300_v32 = vand.u32 2147483647, %v1696_v28  ;;  %v288_v20 = vmax.f32 %v1696_v28, 0.0  ;;  %vm292_vm2 = vcmp.ne.f32.partialorder %v1696_v28, %v1696_v28 }
  0xdb   :  { %v299_v34 = vand.u32 2147483647, %v1698_v30  ;;  %v1316_v35 = vpop.f32.mrb[2].mxu0  ;;  %v287_v21 = vmax.f32 %v1698_v30, 0.0  ;;  %vm291_vm4 = vcmp.ne.f32.partialorder %v1698_v30, %v1698_v30 }
  0xdc   :  { %v304_v36 = vsub.f32 0.0, %v300_v32  ;;  %v1702_v37 = vadd.f32 %v1316_v35, %v59_v31  ;;  %v150_v39 = vpop.f32.mrb[3].mxu0 }
  0xdd   :  { %v1323_v38 = vpop.f32.mrb[0].mxu1  ;;  %v303_v40 = vsub.f32 0.0, %v299_v34  ;;  %v1706_v42 = vadd.f32 %v150_v39, %v54_v33 }
  0xde   :  { %v1704_v41 = vadd.f32 %v1323_v38, %v177_v25  ;;  %v268_v43 = vpop.f32.mrb[1].mxu1  ;;  %v309_v44 = vmul.f32 1.442695, %v304_v36  ;;  %v302_v45 = vand.u32 2147483647, %v1702_v37  ;;  %v290_v22 = vmax.f32 %v1702_v37, 0.0 }
  0xdf   :  { %v307_v46 = vmul.f32 1.442695, %v303_v40  ;;  %v301_v53 = vand.u32 2147483647, %v1706_v42  ;;  %v1711_v54 = vadd.f32 %v268_v43, %v172_v23  ;;  %v289_v32 = vmax.f32 %v1706_v42, 0.0 }
  0xe0   :  { %v428_v47 = vand.u32 2147483647, %v1704_v41  ;;  %1374 = vpow2.f32 %v309_v44  ;;  %v306_v49 = vsub.f32 0.0, %v302_v45  ;;  %v416_v26 = vmax.f32 %v1704_v41, 0.0 }
  0xe1   :  { %v1326_v50 = vpop.f32.mrb[2].mxu1  ;;  %1376 = vpow2.f32 %v307_v46  ;;  %v305_v60 = vsub.f32 0.0, %v301_v53  ;;  %v427_v61 = vand.u32 2147483647, %v1711_v54  ;;  %vm294_vm6 = vcmp.ne.f32.partialorder %v1702_v37, %v1702_v37 }
  0xe2   :  { %v432_v52 = vsub.f32 0.0, %v428_v47  ;;  %v278_v55 = vpop.f32.mrb[3].mxu1  ;;  %v313_v56 = vmul.f32 1.442695, %v306_v49  ;;  %v1713_v57 = vadd.f32 %v1326_v50, %v187_v48  ;;  %vm420_vm7 = vcmp.ne.f32.partialorder %v1704_v41, %v1704_v41 }
  0xe3   :  { %v1715_v58 = vadd.f32 %v278_v55, %v182_v51  ;;  %v311_v62 = vmul.f32 1.442695, %v305_v60  ;;  %v431_v0 = vsub.f32 0.0, %v427_v61  ;;  %vm293_vm11 = vcmp.ne.f32.partialorder %v1706_v42, %v1706_v42 }
  0xe4   :  { %v437_v59 = vmul.f32 1.442695, %v432_v52  ;;  %1378 = vpow2.f32 %v313_v56  ;;  %v430_v63 = vand.u32 2147483647, %v1713_v57  ;;  %vm419_vm14 = vcmp.ne.f32.partialorder %v1711_v54, %v1711_v54 }
  0xe5   :  { %v429_v1 = vand.u32 2147483647, %v1715_v58  ;;  %v435_v3 = vmul.f32 1.442695, %v431_v0  ;;  %vm422_vm15 = vcmp.ne.f32.partialorder %v1713_v57, %v1713_v57 }
  0xe6   :  { %1380 = vpow2.f32 %v437_v59  ;;  %v434_v2 = vsub.f32 0.0, %v430_v63 }
  0xe7   :  { %1382 = vpow2.f32 %v311_v62  ;;  %v433_v4 = vsub.f32 0.0, %v429_v1 }
  0xe8   :  { %v441_v5 = vmul.f32 1.442695, %v434_v2  ;;  %1384 = vpow2.f32 %v435_v3 }
  0xe9   :  { %v439_v7 = vmul.f32 1.442695, %v433_v4 }
  0xea   :  { %v1375_v6 = vpop.eup %1374  ;;  %1386 = vpow2.f32 %v441_v5 }
  0xeb   :  { %v1377_v8 = vpop.eup %1376  ;;  %v324_v9 = vadd.f32 1.0, %v1375_v6  ;;  %1388 = vpow2.f32 %v439_v7  ;;  %v327_v14 = vmul.f32 -0.5, %v1375_v6  ;;  %v330_v18 = vand.u32 2147483647, %v1375_v6 }
  0xec   :  { %v315_v10 = vadd.f32 1.0, %v1377_v8  ;;  %v318_v15 = vmul.f32 -0.5, %v1377_v8  ;;  %v321_v36 = vand.u32 2147483647, %v1377_v8 }
  0xed   :  { %1390 = vlog2.f32 %v324_v9  ;;  %v328_v24 = vadd.f32 1.0, %v327_v14  ;;  %vm1742_vm3 = vcmp.lt.f32.partialorder %v330_v18, 0.0004427343 }
  0xee   :  { %v1720_v11 = vpop.eup %1378  ;;  %1392 = vlog2.f32 %v315_v10  ;;  %v319_v25 = vadd.f32 1.0, %v318_v15  ;;  %vm322_vm5 = vcmp.lt.f32.partialorder %v321_v36, 0.0004427343  ;;  %v418_v36 = vmax.f32 %v1713_v57, 0.0 }
  0xef   :  { %v342_v13 = vadd.f32 1.0, %v1720_v11  ;;  %v345_v29 = vmul.f32 -0.5, %v1720_v11  ;;  %v348_v43 = vand.u32 2147483647, %v1720_v11  ;;  %v329_v48 = vmul.f32 %v1375_v6, %v328_v24 }
  0xf0   :  { %v1722_v12 = vpop.eup %1380  ;;  %v320_v49 = vmul.f32 %v1377_v8, %v319_v25 }
  0xf1   :  { %v452_v16 = vadd.f32 1.0, %v1722_v12  ;;  %v1383_v17 = vpop.eup %1382  ;;  %1394 = vlog2.f32 %v342_v13  ;;  %v455_v31 = vmul.f32 -0.5, %v1722_v12  ;;  %v458_v44 = vand.u32 2147483647, %v1722_v12 }
  0xf2   :  { %v333_v19 = vadd.f32 1.0, %v1383_v17  ;;  %v1729_v23 = vpop.eup %1384  ;;  %v336_v38 = vmul.f32 -0.5, %v1383_v17  ;;  %v346_v51 = vadd.f32 1.0, %v345_v29  ;;  %v339_v56 = vand.u32 2147483647, %v1383_v17 }
  0xf3   :  { %1396 = vlog2.f32 %v452_v16  ;;  %v443_v33 = vadd.f32 1.0, %v1729_v23  ;;  %v456_v52 = vadd.f32 1.0, %v455_v31  ;;  %vm1758_vm8 = vcmp.lt.f32.partialorder %v348_v43, 0.0004427343 }
  0xf4   :  { %1398 = vlog2.f32 %v333_v19  ;;  %v1734_v27 = vpop.eup %1386  ;;  %v337_v55 = vadd.f32 1.0, %v336_v38  ;;  %vm1762_vm9 = vcmp.lt.f32.partialorder %v458_v44, 0.0004427343  ;;  %v446_v3 = vmul.f32 -0.5, %v1729_v23 }
  0xf5   :  { %v1740_v34 = vpop.eup %1388  ;;  %v470_v39 = vadd.f32 1.0, %v1734_v27  ;;  %1400 = vlog2.f32 %v443_v33  ;;  %v473_v4 = vmul.f32 -0.5, %v1734_v27  ;;  %v347_v6 = vmul.f32 %v1720_v11, %v346_v51 }
  0xf6   :  { %v461_v45 = vadd.f32 1.0, %v1740_v34  ;;  %v457_v8 = vmul.f32 %v1722_v12, %v456_v52  ;;  %v338_v10 = vmul.f32 %v1383_v17, %v337_v55  ;;  %vm1777_vm10 = vcmp.lt.f32.partialorder %v339_v56, 0.0004427343 }
  0xf7   :  { %v1391_v40 = vpop.eup %1390  ;;  %1402 = vlog2.f32 %v470_v39  ;;  %v449_v14 = vand.u32 2147483647, %v1729_v23  ;;  %v447_v16 = vadd.f32 1.0, %v446_v3  ;;  %v474_v17 = vadd.f32 1.0, %v473_v4 }
  0xf8   :  { %v1393_v46 = vpop.eup %1392  ;;  %v326_v47 = vmul.f32 0.6931472, %v1391_v40  ;;  %1404 = vlog2.f32 %v461_v45  ;;  %v464_v18 = vmul.f32 -0.5, %v1740_v34  ;;  %v476_v24 = vand.u32 2147483647, %v1734_v27 }
  0xf9   :  { %v317_v50 = vmul.f32 0.6931472, %v1393_v46  ;;  %v415_v31 = vmax.f32 %v1711_v54, 0.0  ;;  %v475_v39 = vmul.f32 %v1734_v27, %v474_v17  ;;  %vm450_vm12 = vcmp.lt.f32.partialorder %v449_v14, 0.0004427343 }
  0xfa   :  { %v332_v53 = vsel %vm1742_vm3, %v329_v48, %v326_v47  ;;  %v465_v40 = vadd.f32 1.0, %v464_v18  ;;  %vm477_vm13 = vcmp.lt.f32.partialorder %v476_v24, 0.0004427343 }
  0xfb   :  { %v1395_v59 = vpop.eup %1394  ;;  %v352_v60 = vadd.f32 %v332_v53, %v288_v20  ;;  %v323_v61 = vsel %vm322_vm5, %v320_v49, %v317_v50 }
  0xfc   :  { %v351_v1 = vadd.f32 %v323_v61, %v287_v21  ;;  %v344_v2 = vmul.f32 0.6931472, %v1395_v59  ;;  %v466_v47 = vmul.f32 %v1740_v34, %v465_v40 }
  0xfd   :  { %v1397_v0 = vpop.eup %1396  ;;  %v1772_v5 = vsel %vm292_vm2, %v1696_v28, %v352_v60 }
  0xfe   :  { %v454_v7 = vmul.f32 0.6931472, %v1397_v0  ;;  %v1399_v9 = vpop.eup %1398  ;;  %1406 = vrsqrt.f32 %v1772_v5  ;;  %v1786_v28 = vsel %vm291_vm4, %v1698_v30, %v351_v1  ;;  %v350_v11 = vsel %vm1758_vm8, %v347_v6, %v344_v2 }
  0xff   :  { %v335_v15 = vmul.f32 0.6931472, %v1399_v9  ;;  %1408 = vrsqrt.f32 %v1786_v28  ;;  %v1401_v19 = vpop.eup %1400  ;;  %v354_v20 = vadd.f32 %v350_v11, %v290_v22  ;;  %vm368_vm0 = vcmp.eq.f32.partialorder %v1772_v5, inf }
 0x100   :  { %v460_v12 = vsel %vm1762_vm9, %v457_v8, %v454_v7  ;;  %v445_v33 = vmul.f32 0.6931472, %v1401_v19  ;;  %v371_v50 = vand.u32 2147483648, %v1772_v5  ;;  %vm370_vm2 = vcmp.eq.f32.partialorder %v1772_v5, 0.0 }
 0x101   :  { %v480_v21 = vadd.f32 %v460_v12, %v416_v26  ;;  %v341_v30 = vsel %vm1777_vm10, %v338_v10, %v335_v15  ;;  %v1403_v25 = vpop.eup %1402  ;;  %v358_v22 = vsel %vm294_vm6, %v1702_v37, %v354_v20  ;;  %v467_v37 = vand.u32 2147483647, %v1740_v34 }
 0x102   :  { %v353_v29 = vadd.f32 %v341_v30, %v289_v32  ;;  %v1405_v35 = vpop.eup %1404  ;;  %v472_v38 = vmul.f32 0.6931472, %v1403_v25  ;;  %1410 = vrsqrt.f32 %v358_v22  ;;  %v448_v32 = vmul.f32 %v1729_v23, %v447_v16 }
 0x103   :  { %v1810_v26 = vsel %vm420_vm7, %v1704_v41, %v480_v21  ;;  %v463_v45 = vmul.f32 0.6931472, %v1405_v35  ;;  %vm468_vm1 = vcmp.lt.f32.partialorder %v467_v37, 0.0004427343  ;;  %vm361_vm3 = vcmp.eq.f32.partialorder %v1786_v28, inf }
 0x104   :  { %1412 = vrsqrt.f32 %v1810_v26  ;;  %v357_v41 = vsel %vm293_vm11, %v1706_v42, %v353_v29  ;;  %v451_v43 = vsel %vm450_vm12, %v448_v32, %v445_v33  ;;  %v478_v44 = vsel %vm477_vm13, %v475_v39, %v472_v38 }
 0x105   :  { %1414 = vrsqrt.f32 %v357_v41  ;;  %v479_v27 = vadd.f32 %v451_v43, %v415_v31  ;;  %v482_v46 = vadd.f32 %v478_v44, %v418_v36  ;;  %v417_v42 = vmax.f32 %v1715_v58, 0.0 }
 0x106   :  { %v469_v53 = vsel %vm468_vm1, %v466_v47, %v463_v45  ;;  %vm363_vm4 = vcmp.eq.f32.partialorder %v1786_v28, 0.0  ;;  %vm382_vm5 = vcmp.eq.f32.partialorder %v358_v22, inf  ;;  %v385_v0 = vand.u32 2147483648, %v358_v22 }
 0x107   :  { %v1831_v51 = vsel %vm419_vm14, %v1711_v54, %v479_v27  ;;  %v1834_v52 = vsel %vm422_vm15, %v1713_v57, %v482_v46  ;;  %v364_v54 = vand.u32 2147483648, %v1786_v28  ;;  %v481_v59 = vadd.f32 %v469_v53, %v417_v42 }
 0x108   :  { %v1407_v23 = vpop.eup %1406  ;;  %1416 = vrsqrt.f32 %v1831_v51  ;;  %vm421_vm6 = vcmp.ne.f32.partialorder %v1715_v58, %v1715_v58  ;;  %vm384_vm7 = vcmp.eq.f32.partialorder %v358_v22, 0.0  ;;  %vm496_vm8 = vcmp.eq.f32.partialorder %v1810_v26, inf }
 0x109   :  { %v367_v48 = vmul.f32 %v1407_v23, %v1772_v5  ;;  %v1409_v49 = vpop.eup %1408  ;;  %1418 = vrsqrt.f32 %v1834_v52  ;;  %v1852_v4 = vsel %vm421_vm6, %v1715_v58, %v481_v59  ;;  %vm498_vm9 = vcmp.eq.f32.partialorder %v1810_v26, 0.0 }
 0x10a   :  { %v360_v34 = vmul.f32 %v1409_v49, %v1786_v28  ;;  %v499_v7 = vand.u32 2147483648, %v1810_v26  ;;  %vm375_vm10 = vcmp.eq.f32.partialorder %v357_v41, inf  ;;  %v378_v8 = vand.u32 2147483648, %v357_v41 }
 0x10b   :  { %v369_v55 = vsel %vm368_vm0, %v1772_v5, %v367_v48  ;;  %vm377_vm11 = vcmp.eq.f32.partialorder %v357_v41, 0.0  ;;  %vm489_vm12 = vcmp.eq.f32.partialorder %v1831_v51, inf  ;;  %vm491_vm13 = vcmp.eq.f32.partialorder %v1831_v51, 0.0 }
 0x10c   :  { %v372_v56 = vsel %vm370_vm2, %v371_v50, %v369_v55  ;;  %v1411_v57 = vpop.eup %1410  ;;  %v362_v60 = vsel %vm361_vm3, %v1786_v28, %v360_v34  ;;  %v492_v12 = vand.u32 2147483648, %v1831_v51  ;;  %vm510_vm0 = vcmp.eq.f32.partialorder %v1834_v52, inf }
 0x10d   :  { %1420 = vrsqrt.f32 %v372_v56  ;;  %v1845_v62 = vsel %vm363_vm4, %v364_v54, %v362_v60  ;;  %v381_v63 = vmul.f32 %v1411_v57, %v358_v22  ;;  %vm396_vm14 = vcmp.eq.f32.partialorder %v372_v56, inf }
 0x10e   :  { %v1413_v61 = vpop.eup %1412  ;;  %1422 = vrsqrt.f32 %v1845_v62  ;;  %vm398_vm15 = vcmp.eq.f32.partialorder %v372_v56, 0.0  ;;  %v399_v18 = vand.u32 2147483648, %v372_v56  ;;  %v513_v19 = vand.u32 2147483648, %v1834_v52 }
 0x10f   :  { %v1415_v1 = vpop.eup %1414  ;;  %v383_v2 = vsel %vm382_vm5, %v358_v22, %v381_v63  ;;  %v495_v3 = vmul.f32 %v1413_v61, %v1810_v26  ;;  %vm512_vm1 = vcmp.eq.f32.partialorder %v1834_v52, 0.0  ;;  %vm389_vm2 = vcmp.eq.f32.partialorder %v1845_v62, inf }
 0x110   :  { %v1854_v5 = vsel %vm384_vm7, %v385_v0, %v383_v2  ;;  %v374_v6 = vmul.f32 %v1415_v1, %v357_v41  ;;  %v392_v22 = vand.u32 2147483648, %v1845_v62  ;;  %vm391_vm3 = vcmp.eq.f32.partialorder %v1845_v62, 0.0 }
 0x111   :  { %1424 = vrsqrt.f32 %v1854_v5  ;;  %v497_v9 = vsel %vm496_vm8, %v1810_v26, %v495_v3  ;;  %vm503_vm4 = vcmp.eq.f32.partialorder %v1852_v4, inf  ;;  %vm505_vm5 = vcmp.eq.f32.partialorder %v1852_v4, 0.0 }
 0x112   :  { %v376_v10 = vsel %vm375_vm10, %v357_v41, %v374_v6  ;;  %1426 = vrsqrt.f32 %v1852_v4  ;;  %v1417_v58 = vpop.eup %1416  ;;  %v1862_v13 = vsel %vm498_vm9, %v499_v7, %v497_v9  ;;  %vm410_vm6 = vcmp.eq.f32.partialorder %v1854_v5, inf }
 0x113   :  { %v1864_v14 = vsel %vm377_vm11, %v378_v8, %v376_v10  ;;  %v1419_v28 = vpop.eup %1418  ;;  %1428 = vrsqrt.f32 %v1862_v13  ;;  %v488_v16 = vmul.f32 %v1417_v58, %v1831_v51  ;;  %v413_v41 = vand.u32 2147483648, %v1854_v5 }
 0x114   :  { %1430 = vrsqrt.f32 %v1864_v14  ;;  %v509_v17 = vmul.f32 %v1419_v28, %v1834_v52  ;;  %v506_v43 = vand.u32 2147483648, %v1852_v4  ;;  %vm412_vm7 = vcmp.eq.f32.partialorder %v1854_v5, 0.0 }
 0x115   :  { %v490_v30 = vsel %vm489_vm12, %v1831_v51, %v488_v16  ;;  %vm524_vm8 = vcmp.eq.f32.partialorder %v1862_v13, inf  ;;  %vm526_vm9 = vcmp.eq.f32.partialorder %v1862_v13, 0.0  ;;  %v527_v50 = vand.u32 2147483648, %v1862_v13 }
 0x116   :  { %v511_v24 = vsel %vm510_vm0, %v1834_v52, %v509_v17  ;;  %v1883_v31 = vsel %vm491_vm13, %v492_v12, %v490_v30  ;;  %vm403_vm10 = vcmp.eq.f32.partialorder %v1864_v14, inf  ;;  %v406_v57 = vand.u32 2147483648, %v1864_v14 }
 0x117   :  { %v1421_v11 = vpop.eup %1420  ;;  %v1885_v33 = vsel %vm512_vm1, %v513_v19, %v511_v24  ;;  %1432 = vrsqrt.f32 %v1883_v31  ;;  %vm405_vm11 = vcmp.eq.f32.partialorder %v1864_v14, 0.0  ;;  %vm517_vm12 = vcmp.eq.f32.partialorder %v1883_v31, inf }
 0x118   :  { %v395_v15 = vmul.f32 %v1421_v11, %v372_v56  ;;  %v1423_v20 = vpop.eup %1422  ;;  %1434 = vrsqrt.f32 %v1885_v33  ;;  %vm519_vm13 = vcmp.eq.f32.partialorder %v1883_v31, 0.0  ;;  %v541_v28 = vand.u32 2147483648, %v1885_v33 }
 0x119   :  { %v388_v29 = vmul.f32 %v1423_v20, %v1845_v62 }
 0x11a   :  { %v397_v21 = vsel %vm396_vm14, %v372_v56, %v395_v15  ;;  %vm538_vm14 = vcmp.eq.f32.partialorder %v1885_v33, inf }
 0x11b   :  { %v1878_v25 = vsel %vm398_vm15, %v399_v18, %v397_v21  ;;  %v1425_v26 = vpop.eup %1424  ;;  %v390_v36 = vsel %vm389_vm2, %v1845_v62, %v388_v29  ;;  %vm540_vm15 = vcmp.eq.f32.partialorder %v1885_v33, 0.0 }
 0x11c   :  { %v556_v35 = vand.u32 2147483647, %v1878_v25  ;;  %v1427_v38 = vpop.eup %1426  ;;  %v1895_v39 = vsel %vm391_vm3, %v392_v22, %v390_v36  ;;  %v409_v40 = vmul.f32 %v1425_v26, %v1854_v5  ;;  %vm548_vm2 = vcmp.ne.f32.partialorder %v1878_v25, %v1878_v25 }
 0x11d   :  { %v555_v37 = vand.u32 2147483647, %v1895_v39  ;;  %v1429_v44 = vpop.eup %1428  ;;  %v502_v42 = vmul.f32 %v1427_v38, %v1852_v4 }
 0x11e   :  { %v560_v32 = vsub.f32 0.0, %v556_v35  ;;  %v411_v23 = vsel %vm410_vm6, %v1854_v5, %v409_v40  ;;  %v1431_v27 = vpop.eup %1430  ;;  %v523_v48 = vmul.f32 %v1429_v44, %v1862_v13 }
 0x11f   :  { %v559_v46 = vsub.f32 0.0, %v555_v37  ;;  %v1906_v47 = vsel %vm412_vm7, %v413_v41, %v411_v23  ;;  %v402_v53 = vmul.f32 %v1431_v27, %v1864_v14  ;;  %v504_v55 = vsel %vm503_vm4, %v1852_v4, %v502_v42 }
 0x120   :  { %v565_v45 = vmul.f32 1.442695, %v560_v32  ;;  %v558_v49 = vand.u32 2147483647, %v1906_v47  ;;  %v525_v52 = vsel %vm524_vm8, %v1862_v13, %v523_v48  ;;  %v507_v54 = vsel %vm505_vm5, %v506_v43, %v504_v55 }
 0x121   :  { %v563_v51 = vmul.f32 1.442695, %v559_v46  ;;  %v1918_v56 = vsel %vm526_vm9, %v527_v50, %v525_v52  ;;  %v1433_v60 = vpop.eup %1432  ;;  %v404_v62 = vsel %vm403_vm10, %v1864_v14, %v402_v53  ;;  %v520_v4 = vand.u32 2147483648, %v1883_v31 }
 0x122   :  { %1436 = vpow2.f32 %v565_v45  ;;  %v562_v34 = vsub.f32 0.0, %v558_v49  ;;  %v684_v59 = vand.u32 2147483647, %v1918_v56  ;;  %v1927_v0 = vsel %vm405_vm11, %v406_v57, %v404_v62  ;;  %v1435_v2 = vpop.eup %1434 }
 0x123   :  { %1438 = vpow2.f32 %v563_v51  ;;  %v516_v1 = vmul.f32 %v1433_v60, %v1883_v31  ;;  %v557_v3 = vand.u32 2147483647, %v1927_v0  ;;  %v537_v7 = vmul.f32 %v1435_v2, %v1885_v33 }
 0x124   :  { %v569_v61 = vmul.f32 1.442695, %v562_v34  ;;  %1440 = vrsqrt.f32 %v507_v54  ;;  %v688_v63 = vsub.f32 0.0, %v684_v59  ;;  %vm531_vm0 = vcmp.eq.f32.partialorder %v507_v54, inf }
 0x125   :  { %v518_v6 = vsel %vm517_vm12, %v1883_v31, %v516_v1  ;;  %v561_v8 = vsub.f32 0.0, %v557_v3  ;;  %v539_v14 = vsel %vm538_vm14, %v1885_v33, %v537_v7  ;;  %v534_v22 = vand.u32 2147483648, %v507_v54 }
 0x126   :  { %1442 = vpow2.f32 %v569_v61  ;;  %v693_v5 = vmul.f32 1.442695, %v688_v63  ;;  %v1936_v9 = vsel %vm519_vm13, %v520_v4, %v518_v6  ;;  %v1943_v15 = vsel %vm540_vm15, %v541_v28, %v539_v14 }
 0x127   :  { %v683_v10 = vand.u32 2147483647, %v1936_v9  ;;  %v567_v13 = vmul.f32 1.442695, %v561_v8  ;;  %v686_v20 = vand.u32 2147483647, %v1943_v15  ;;  %vm547_vm5 = vcmp.ne.f32.partialorder %v1895_v39, %v1895_v39 }
 0x128   :  { %1444 = vpow2.f32 %v693_v5  ;;  %vm533_vm1 = vcmp.eq.f32.partialorder %v507_v54, 0.0  ;;  %v544_v52 = vmax.f32 %v1878_v25, 0.0  ;;  %v543_v34 = vmax.f32 %v1895_v39, 0.0 }
 0x129   :  { %v687_v12 = vsub.f32 0.0, %v683_v10  ;;  %1446 = vpow2.f32 %v567_v13  ;;  %v690_v31 = vsub.f32 0.0, %v686_v20  ;;  %v672_v28 = vmax.f32 %v1918_v56, 0.0 }
 0x12a   :  { %vm550_vm8 = vcmp.ne.f32.partialorder %v1906_v47, %v1906_v47  ;;  %vm676_vm9 = vcmp.ne.f32.partialorder %v1918_v56, %v1918_v56  ;;  %vm549_vm12 = vcmp.ne.f32.partialorder %v1927_v0, %v1927_v0  ;;  %vm675_vm13 = vcmp.ne.f32.partialorder %v1936_v9, %v1936_v9 }
 0x12b   :  { %v691_v17 = vmul.f32 1.442695, %v687_v12  ;;  %v697_v36 = vmul.f32 1.442695, %v690_v31  ;;  %vm1059_vm14 = vcmask 261120  }
 0x12c   :  { %v1437_v58 = vpop.eup %1436 }
 0x12d   :  { %v580_v11 = vadd.f32 1.0, %v1437_v58  ;;  %v1439_v16 = vpop.eup %1438  ;;  %v583_v30 = vmul.f32 -0.5, %v1437_v58  ;;  %v586_v37 = vand.u32 2147483647, %v1437_v58 }
 0x12e   :  { %v1441_v18 = vpop.eup %1440  ;;  %v571_v19 = vadd.f32 1.0, %v1439_v16  ;;  %v574_v33 = vmul.f32 -0.5, %v1439_v16  ;;  %v577_v23 = vand.u32 2147483647, %v1439_v16 }
 0x12f   :  { %1448 = vlog2.f32 %v580_v11  ;;  %v530_v24 = vmul.f32 %v1441_v18, %v507_v54  ;;  %v584_v38 = vadd.f32 1.0, %v583_v30  ;;  %vm587_vm3 = vcmp.lt.f32.partialorder %v586_v37, 0.0004427343 }
 0x130   :  { %1450 = vpow2.f32 %v691_v17  ;;  %v1946_v21 = vpop.eup %1442  ;;  %v575_v43 = vadd.f32 1.0, %v574_v33  ;;  %vm578_vm4 = vcmp.lt.f32.partialorder %v577_v23, 0.0004427343 }
 0x131   :  { %1452 = vlog2.f32 %v571_v19  ;;  %v598_v29 = vadd.f32 1.0, %v1946_v21  ;;  %v532_v35 = vsel %vm531_vm0, %v507_v54, %v530_v24  ;;  %v601_v27 = vmul.f32 -0.5, %v1946_v21 }
 0x132   :  { %v1949_v26 = vpop.eup %1444  ;;  %v1952_v40 = vsel %vm533_vm1, %v534_v22, %v532_v35  ;;  %v585_v42 = vmul.f32 %v1437_v58, %v584_v38  ;;  %v576_v54 = vmul.f32 %v1439_v16, %v575_v43  ;;  %v604_v63 = vand.u32 2147483647, %v1946_v21 }
 0x133   :  { %1454 = vlog2.f32 %v598_v29  ;;  %v708_v32 = vadd.f32 1.0, %v1949_v26  ;;  %v1954_v41 = vpop.eup %1446  ;;  %v685_v44 = vand.u32 2147483647, %v1952_v40  ;;  %v711_v49 = vmul.f32 -0.5, %v1949_v26 }
 0x134   :  { %1456 = vpow2.f32 %v697_v36  ;;  %v589_v46 = vadd.f32 1.0, %v1954_v41  ;;  %v602_v61 = vadd.f32 1.0, %v601_v27  ;;  %v592_v5 = vmul.f32 -0.5, %v1954_v41 }
 0x135   :  { %1458 = vlog2.f32 %v708_v32  ;;  %v689_v50 = vsub.f32 0.0, %v685_v44  ;;  %v712_v1 = vadd.f32 1.0, %v711_v49  ;;  %v714_v6 = vand.u32 2147483647, %v1949_v26 }
 0x136   :  { %1460 = vlog2.f32 %v589_v46  ;;  %v546_v58 = vmax.f32 %v1906_v47, 0.0  ;;  %v603_v13 = vmul.f32 %v1946_v21, %v602_v61  ;;  %vm605_vm6 = vcmp.lt.f32.partialorder %v604_v63, 0.0004427343 }
 0x137   :  { %v695_v62 = vmul.f32 1.442695, %v689_v50  ;;  %v713_v11 = vmul.f32 %v1949_v26, %v712_v1  ;;  %v593_v19 = vadd.f32 1.0, %v592_v5  ;;  %vm715_vm7 = vcmp.lt.f32.partialorder %v714_v6, 0.0004427343  ;;  %v1057_v50 = vld [vmem:[%s2334_s7] sm:$0xff] }
 0x138   :  { %v595_v20 = vand.u32 2147483647, %v1954_v41  ;;  %v545_v36 = vmax.f32 %v1927_v0, 0.0  ;;  %1335 = vmatprep.mubr.msk.f32.mxu1 %vm1059_vm14, %v1057_v50 }
 0x139   :  { %v1449_v45 = vpop.eup %1448  ;;  %v594_v22 = vmul.f32 %v1954_v41, %v593_v19  ;;  %v671_v41 = vmax.f32 %v1936_v9, 0.0 }
 0x13a   :  { %v582_v48 = vmul.f32 0.6931472, %v1449_v45  ;;  %v1960_v51 = vpop.eup %1450  ;;  %vm596_vm10 = vcmp.lt.f32.partialorder %v595_v20, 0.0004427343 }
 0x13b   :  { %v1453_v53 = vpop.eup %1452  ;;  %v699_v59 = vadd.f32 1.0, %v1960_v51  ;;  %v702_v7 = vmul.f32 -0.5, %v1960_v51 }
 0x13c   :  { %v588_v55 = vsel %vm587_vm3, %v585_v42, %v582_v48  ;;  %v573_v60 = vmul.f32 0.6931472, %v1453_v53 }
 0x13d   :  { %v608_v57 = vadd.f32 %v588_v55, %v544_v52  ;;  %1462 = vlog2.f32 %v699_v59  ;;  %v1455_v2 = vpop.eup %1454  ;;  %v703_v21 = vadd.f32 1.0, %v702_v7 }
 0x13e   :  { %v579_v4 = vsel %vm578_vm4, %v576_v54, %v573_v60  ;;  %1464 = vpow2.f32 %v695_v62  ;;  %v1980_v8 = vpop.eup %1456  ;;  %vm678_vm4 = vcmp.ne.f32.partialorder %v1943_v15, %v1943_v15 }
 0x13f   :  { %v1972_v3 = vsel %vm548_vm2, %v1878_v25, %v608_v57  ;;  %v607_v10 = vadd.f32 %v579_v4, %v543_v34  ;;  %v600_v25 = vmul.f32 0.6931472, %v1455_v2  ;;  %v1459_v14 = vpop.eup %1458  ;;  %v726_v12 = vadd.f32 1.0, %v1980_v8 }
 0x140   :  { %1466 = vrsqrt.f32 %v1972_v3  ;;  %v710_v18 = vmul.f32 0.6931472, %v1459_v14  ;;  %v1461_v30 = vpop.eup %1460  ;;  %v704_v38 = vmul.f32 %v1960_v51, %v703_v21  ;;  %v729_v44 = vmul.f32 -0.5, %v1980_v8 }
 0x141   :  { %v1988_v16 = vsel %vm547_vm5, %v1895_v39, %v607_v10  ;;  %v606_v17 = vsel %vm605_vm6, %v603_v13, %v600_v25  ;;  %v591_v33 = vmul.f32 0.6931472, %v1461_v30  ;;  %v705_v39 = vand.u32 2147483647, %v1960_v51  ;;  %v1055_v51 = vld [vmem:[%s2335_s6] sm:$0xff] }
 0x142   :  { %1468 = vrsqrt.f32 %v1988_v16  ;;  %v610_v24 = vadd.f32 %v606_v17, %v546_v58  ;;  %v716_v29 = vsel %vm715_vm7, %v713_v11, %v710_v18  ;;  %vm624_vm15 = vcmp.eq.f32.partialorder %v1972_v3, inf  ;;  %1346 = vmatprep.mubr.msk.f32.mxu0 %vm1059_vm14, %v1055_v51 }
 0x143   :  { %1470 = vlog2.f32 %v726_v12  ;;  %v736_v31 = vadd.f32 %v716_v29, %v672_v28  ;;  %vm706_vm11 = vcmp.lt.f32.partialorder %v705_v39, 0.0004427343  ;;  %v730_v49 = vadd.f32 1.0, %v729_v44 }
 0x144   :  { %v1996_v35 = vsel %vm550_vm8, %v1906_v47, %v610_v24  ;;  %v597_v47 = vsel %vm596_vm10, %v594_v22, %v591_v33  ;;  %vm626_vm0 = vcmp.eq.f32.partialorder %v1972_v3, 0.0  ;;  %v627_v34 = vand.u32 2147483648, %v1972_v3 }
 0x145   :  { %1472 = vrsqrt.f32 %v1996_v35  ;;  %v2007_v37 = vsel %vm676_vm9, %v1918_v56, %v736_v31  ;;  %v609_v27 = vadd.f32 %v597_v47, %v545_v36  ;;  %vm617_vm1 = vcmp.eq.f32.partialorder %v1988_v16, inf }
 0x146   :  { %1474 = vrsqrt.f32 %v2007_v37  ;;  %vm619_vm2 = vcmp.eq.f32.partialorder %v1988_v16, 0.0  ;;  %v620_v57 = vand.u32 2147483648, %v1988_v16  ;;  %v731_v63 = vmul.f32 %v1980_v8, %v730_v49 }
 0x147   :  { %v1463_v26 = vpop.eup %1462  ;;  %v2020_v42 = vsel %vm549_vm12, %v1927_v0, %v609_v27  ;;  %v732_v0 = vand.u32 2147483647, %v1980_v8  ;;  %vm638_vm5 = vcmp.eq.f32.partialorder %v1996_v35, inf  ;;  %vm640_vm6 = vcmp.eq.f32.partialorder %v1996_v35, 0.0 }
 0x148   :  { %v2004_v32 = vpop.eup %1464  ;;  %v701_v43 = vmul.f32 0.6931472, %v1463_v26  ;;  %vm752_vm7 = vcmp.eq.f32.partialorder %v2007_v37, inf  ;;  %v755_v14 = vand.u32 2147483648, %v2007_v37  ;;  %vm754_vm8 = vcmp.eq.f32.partialorder %v2007_v37, 0.0 }
 0x149   :  { %v717_v48 = vadd.f32 1.0, %v2004_v32  ;;  %v720_v60 = vmul.f32 -0.5, %v2004_v32  ;;  %vm733_vm3 = vcmp.lt.f32.partialorder %v732_v0, 0.0004427343  ;;  %v723_v13 = vand.u32 2147483647, %v2004_v32 }
 0x14a   :  { %v1467_v45 = vpop.eup %1466  ;;  %v707_v46 = vsel %vm706_vm11, %v704_v38, %v701_v43  ;;  %v673_v21 = vmax.f32 %v1952_v40, 0.0  ;;  %vm631_vm10 = vcmp.eq.f32.partialorder %v2020_v42, inf  ;;  %v634_v24 = vand.u32 2147483648, %v2020_v42 }
 0x14b   :  { %v623_v23 = vmul.f32 %v1467_v45, %v1972_v3  ;;  %v735_v56 = vadd.f32 %v707_v46, %v671_v41  ;;  %1476 = vlog2.f32 %v717_v48  ;;  %v721_v10 = vadd.f32 1.0, %v720_v60 }
 0x14c   :  { %v1469_v52 = vpop.eup %1468  ;;  %1478 = vrsqrt.f32 %v2020_v42  ;;  %vm724_vm9 = vcmp.lt.f32.partialorder %v723_v13, 0.0004427343  ;;  %vm677_vm11 = vcmp.ne.f32.partialorder %v1952_v40, %v1952_v40  ;;  %vm633_vm12 = vcmp.eq.f32.partialorder %v2020_v42, 0.0 }
 0x14d   :  { %v625_v53 = vsel %vm624_vm15, %v1972_v3, %v623_v23  ;;  %v1471_v55 = vpop.eup %1470  ;;  %v616_v54 = vmul.f32 %v1469_v52, %v1988_v16  ;;  %v2041_v59 = vsel %vm675_vm13, %v1936_v9, %v735_v56  ;;  %v674_v9 = vmax.f32 %v1943_v15, 0.0 }
 0x14e   :  { %1480 = vrsqrt.f32 %v2041_v59  ;;  %v728_v62 = vmul.f32 0.6931472, %v1471_v55  ;;  %v2051_v1 = vsel %vm626_vm0, %v627_v34, %v625_v53  ;;  %v641_v3 = vand.u32 2147483648, %v1996_v35 }
 0x14f   :  { %v618_v61 = vsel %vm617_vm1, %v1988_v16, %v616_v54  ;;  %v1473_v2 = vpop.eup %1472  ;;  %1482 = vrsqrt.f32 %v2051_v1  ;;  %v722_v19 = vmul.f32 %v2004_v32, %v721_v10  ;;  %vm745_vm13 = vcmp.eq.f32.partialorder %v2041_v59, inf }
 0x150   :  { %v2054_v4 = vsel %vm619_vm2, %v620_v57, %v618_v61  ;;  %v637_v5 = vmul.f32 %v1473_v2, %v1996_v35  ;;  %v734_v6 = vsel %vm733_vm3, %v731_v63, %v728_v62  ;;  %v1475_v7 = vpop.eup %1474  ;;  %vm747_vm15 = vcmp.eq.f32.partialorder %v2041_v59, 0.0 }
 0x151   :  { %1484 = vrsqrt.f32 %v2054_v4  ;;  %v738_v8 = vadd.f32 %v734_v6, %v674_v9  ;;  %v751_v25 = vmul.f32 %v1475_v7, %v2007_v37  ;;  %v748_v22 = vand.u32 2147483648, %v2041_v59 }
 0x152   :  { %v639_v58 = vsel %vm638_vm5, %v1996_v35, %v637_v5  ;;  %vm652_vm0 = vcmp.eq.f32.partialorder %v2051_v1, inf  ;;  %vm654_vm1 = vcmp.eq.f32.partialorder %v2051_v1, 0.0  ;;  %v655_v47 = vand.u32 2147483648, %v2051_v1 }
 0x153   :  { %v2070_v28 = vsel %vm678_vm4, %v1943_v15, %v738_v8  ;;  %v2072_v11 = vsel %vm640_vm6, %v641_v3, %v639_v58  ;;  %v753_v16 = vsel %vm752_vm7, %v2007_v37, %v751_v25  ;;  %vm645_vm2 = vcmp.eq.f32.partialorder %v2054_v4, inf }
 0x154   :  { %1486 = vrsqrt.f32 %v2070_v28  ;;  %v2078_v20 = vsel %vm754_vm8, %v755_v14, %v753_v16  ;;  %vm647_vm3 = vcmp.eq.f32.partialorder %v2054_v4, 0.0  ;;  %v648_v45 = vand.u32 2147483648, %v2054_v4 }
 0x155   :  { %v1477_v12 = vpop.eup %1476  ;;  %1488 = vrsqrt.f32 %v2072_v11  ;;  %vm766_vm4 = vcmp.eq.f32.partialorder %v2070_v28, inf  ;;  %vm768_vm5 = vcmp.eq.f32.partialorder %v2070_v28, 0.0  ;;  %vm780_vm6 = vcmp.eq.f32.partialorder %v2078_v20, inf }
 0x156   :  { %v1479_v17 = vpop.eup %1478  ;;  %v719_v18 = vmul.f32 0.6931472, %v1477_v12  ;;  %1490 = vrsqrt.f32 %v2078_v20  ;;  %vm782_vm7 = vcmp.eq.f32.partialorder %v2078_v20, 0.0  ;;  %v783_v53 = vand.u32 2147483648, %v2078_v20 }
 0x157   :  { %v630_v15 = vmul.f32 %v1479_v17, %v2020_v42  ;;  %vm666_vm8 = vcmp.eq.f32.partialorder %v2072_v11, inf  ;;  %v669_v57 = vand.u32 2147483648, %v2072_v11 }
 0x158   :  { %v1481_v30 = vpop.eup %1480  ;;  %v725_v29 = vsel %vm724_vm9, %v722_v19, %v719_v18  ;;  %vm668_vm9 = vcmp.eq.f32.partialorder %v2072_v11, 0.0 }
 0x159   :  { %v632_v31 = vsel %vm631_vm10, %v2020_v42, %v630_v15  ;;  %v744_v33 = vmul.f32 %v1481_v30, %v2041_v59  ;;  %v737_v39 = vadd.f32 %v725_v29, %v673_v21  ;;  %v1483_v35 = vpop.eup %1482  ;;  %v769_v42 = vand.u32 2147483648, %v2070_v28 }
 0x15a   :  { %v2094_v26 = vsel %vm633_vm12, %v634_v24, %v632_v31  ;;  %v651_v37 = vmul.f32 %v1483_v35, %v2051_v1 }
 0x15b   :  { %v1485_v36 = vpop.eup %1484  ;;  %v746_v38 = vsel %vm745_vm13, %v2041_v59, %v744_v33  ;;  %v2098_v32 = vsel %vm677_vm11, %v1952_v40, %v737_v39  ;;  %1492 = vrsqrt.f32 %v2094_v26  ;;  %vm659_vm12 = vcmp.eq.f32.partialorder %v2094_v26, inf }
 0x15c   :  { %1494 = vrsqrt.f32 %v2098_v32  ;;  %v644_v43 = vmul.f32 %v1485_v36, %v2054_v4  ;;  %v653_v44 = vsel %vm652_vm0, %v2051_v1, %v651_v37  ;;  %v2109_v40 = vsel %vm747_vm15, %v748_v22, %v746_v38 }
 0x15d   :  { %v2113_v41 = vsel %vm654_vm1, %v655_v47, %v653_v44  ;;  %1496 = vrsqrt.f32 %v2109_v40  ;;  %vm759_vm10 = vcmp.eq.f32.partialorder %v2098_v32, inf  ;;  %vm761_vm11 = vcmp.eq.f32.partialorder %v2098_v32, 0.0 }
 0x15e   :  { %v1487_v23 = vpop.eup %1486  ;;  %v646_v27 = vsel %vm645_vm2, %v2054_v4, %v644_v43  ;;  %v812_v46 = vand.u32 2147483647, %v2113_v41  ;;  %v662_v3 = vand.u32 2147483648, %v2094_v26  ;;  %vm661_vm13 = vcmp.eq.f32.partialorder %v2094_v26, 0.0 }
 0x15f   :  { %v1489_v48 = vpop.eup %1488  ;;  %v765_v56 = vmul.f32 %v1487_v23, %v2070_v28  ;;  %v2122_v49 = vsel %vm647_vm3, %v648_v45, %v646_v27  ;;  %v762_v14 = vand.u32 2147483648, %v2098_v32  ;;  %vm773_vm15 = vcmp.eq.f32.partialorder %v2109_v40, inf }
 0x160   :  { %v1491_v50 = vpop.eup %1490  ;;  %v811_v51 = vand.u32 2147483647, %v2122_v49  ;;  %v816_v52 = vsub.f32 0.0, %v812_v46  ;;  %v665_v34 = vmul.f32 %v1489_v48, %v2072_v11  ;;  %v776_v12 = vand.u32 2147483648, %v2109_v40 }
 0x161   :  { %v767_v0 = vsel %vm766_vm4, %v2070_v28, %v765_v56  ;;  %v779_v55 = vmul.f32 %v1491_v50, %v2078_v20  ;;  %vm775_vm0 = vcmp.eq.f32.partialorder %v2109_v40, 0.0  ;;  %v800_v27 = vmax.f32 %v2113_v41, 0.0 }
 0x162   :  { %v815_v54 = vsub.f32 0.0, %v811_v51  ;;  %v821_v59 = vmul.f32 1.442695, %v816_v52  ;;  %v2135_v60 = vsel %vm768_vm5, %v769_v42, %v767_v0  ;;  %v667_v62 = vsel %vm666_vm8, %v2072_v11, %v665_v34 }
 0x163   :  { %v781_v61 = vsel %vm780_vm6, %v2078_v20, %v779_v55  ;;  %1498 = vrsqrt.f32 %v2135_v60  ;;  %v2145_v9 = vsel %vm668_vm9, %v669_v57, %v667_v62  ;;  %vm794_vm1 = vcmp.eq.f32.partialorder %v2135_v60, inf }
 0x164   :  { %v819_v1 = vmul.f32 1.442695, %v815_v54  ;;  %1500 = vpow2.f32 %v821_v59  ;;  %v2143_v2 = vsel %vm782_vm7, %v783_v53, %v781_v61  ;;  %v814_v25 = vand.u32 2147483647, %v2145_v9 }
 0x165   :  { %v1493_v63 = vpop.eup %1492  ;;  %v940_v5 = vand.u32 2147483647, %v2143_v2  ;;  %v797_v37 = vand.u32 2147483648, %v2135_v60  ;;  %vm796_vm2 = vcmp.eq.f32.partialorder %v2135_v60, 0.0  ;;  %vm804_vm3 = vcmp.ne.f32.partialorder %v2113_v41, %v2113_v41 }
 0x166   :  { %v1495_v4 = vpop.eup %1494  ;;  %v658_v6 = vmul.f32 %v1493_v63, %v2094_v26  ;;  %1502 = vpow2.f32 %v819_v1  ;;  %v818_v19 = vsub.f32 0.0, %v814_v25  ;;  %v799_v55 = vmax.f32 %v2122_v49, 0.0 }
 0x167   :  { %v758_v7 = vmul.f32 %v1495_v4, %v2098_v32  ;;  %v1497_v8 = vpop.eup %1496  ;;  %v944_v10 = vsub.f32 0.0, %v940_v5  ;;  %vm803_vm8 = vcmp.ne.f32.partialorder %v2122_v49, %v2122_v49 }
 0x168   :  { %v660_v58 = vsel %vm659_vm12, %v2094_v26, %v658_v6  ;;  %v772_v28 = vmul.f32 %v1497_v8, %v2109_v40  ;;  %v825_v24 = vmul.f32 1.442695, %v818_v19 }
 0x169   :  { %v760_v13 = vsel %vm759_vm10, %v2098_v32, %v758_v7  ;;  %v2160_v11 = vsel %vm661_vm13, %v662_v3, %v660_v58  ;;  %v949_v16 = vmul.f32 1.442695, %v944_v10  ;;  %vm932_vm10 = vcmp.ne.f32.partialorder %v2143_v2, %v2143_v2 }
 0x16a   :  { %v813_v17 = vand.u32 2147483647, %v2160_v11  ;;  %v774_v18 = vsel %vm773_vm15, %v2109_v40, %v772_v28  ;;  %v2169_v20 = vsel %vm761_vm11, %v762_v14, %v760_v13  ;;  %vm806_vm15 = vcmp.ne.f32.partialorder %v2145_v9, %v2145_v9 }
 0x16b   :  { %v2171_v15 = vsel %vm775_vm0, %v776_v12, %v774_v18  ;;  %1504 = vpow2.f32 %v949_v16  ;;  %vm787_vm4 = vcmp.eq.f32.partialorder %v2169_v20, inf  ;;  %vm789_vm5 = vcmp.eq.f32.partialorder %v2169_v20, 0.0 }
 0x16c   :  { %v817_v21 = vsub.f32 0.0, %v813_v17  ;;  %v939_v30 = vand.u32 2147483647, %v2171_v15  ;;  %1506 = vrsqrt.f32 %v2169_v20  ;;  %v790_v1 = vand.u32 2147483648, %v2169_v20 }
 0x16d   :  { %v1499_v29 = vpop.eup %1498  ;;  %1508 = vpow2.f32 %v825_v24  ;;  %vm805_vm0 = vcmp.ne.f32.partialorder %v2160_v11, %v2160_v11 }
 0x16e   :  { %v823_v31 = vmul.f32 1.442695, %v817_v21  ;;  %v1501_v33 = vpop.eup %1500  ;;  %v943_v39 = vsub.f32 0.0, %v939_v30  ;;  %v793_v35 = vmul.f32 %v1499_v29, %v2135_v60 }
 0x16f   :  { %v836_v22 = vadd.f32 1.0, %v1501_v33  ;;  %v839_v47 = vmul.f32 -0.5, %v1501_v33  ;;  %v842_v52 = vand.u32 2147483647, %v1501_v33 }
 0x170   :  { %1510 = vpow2.f32 %v823_v31  ;;  %v1503_v26 = vpop.eup %1502  ;;  %v947_v36 = vmul.f32 1.442695, %v943_v39  ;;  %v795_v32 = vsel %vm794_vm1, %v2135_v60, %v793_v35 }
 0x171   :  { %v827_v38 = vadd.f32 1.0, %v1503_v26  ;;  %1512 = vlog2.f32 %v836_v22  ;;  %v2180_v43 = vsel %vm796_vm2, %v797_v37, %v795_v32  ;;  %v830_v40 = vmul.f32 -0.5, %v1503_v26 }
 0x172   :  { %1514 = vpow2.f32 %v947_v36  ;;  %v942_v46 = vand.u32 2147483647, %v2180_v43  ;;  %v840_v56 = vadd.f32 1.0, %v839_v47  ;;  %v833_v59 = vand.u32 2147483647, %v1503_v26 }
 0x173   :  { %1516 = vlog2.f32 %v827_v38  ;;  %v831_v51 = vadd.f32 1.0, %v830_v40  ;;  %vm843_vm6 = vcmp.lt.f32.partialorder %v842_v52, 0.0004427343  ;;  %vm931_vm2 = vcmp.ne.f32.partialorder %v2171_v15, %v2171_v15 }
 0x174   :  { %v946_v60 = vsub.f32 0.0, %v942_v46  ;;  %v841_v63 = vmul.f32 %v1501_v33, %v840_v56  ;;  %vm834_vm7 = vcmp.lt.f32.partialorder %v833_v59, 0.0004427343 }
 0x175   :  { %v1505_v44 = vpop.eup %1504  ;;  %v832_v5 = vmul.f32 %v1503_v26, %v831_v51 }
 0x176   :  { %v964_v45 = vadd.f32 1.0, %v1505_v44  ;;  %v1507_v23 = vpop.eup %1506  ;;  %v967_v53 = vmul.f32 -0.5, %v1505_v44  ;;  %v953_v13 = vmul.f32 1.442695, %v946_v60  ;;  %v970_v28 = vand.u32 2147483647, %v1505_v44 }
 0x177   :  { %v2184_v48 = vpop.eup %1508  ;;  %v786_v42 = vmul.f32 %v1507_v23, %v2169_v20  ;;  %v802_v23 = vmax.f32 %v2145_v9, 0.0 }
 0x178   :  { %1518 = vlog2.f32 %v964_v45  ;;  %v854_v0 = vadd.f32 1.0, %v2184_v48  ;;  %v968_v7 = vadd.f32 1.0, %v967_v53  ;;  %v857_v10 = vmul.f32 -0.5, %v2184_v48 }
 0x179   :  { %v788_v57 = vsel %vm787_vm4, %v2169_v20, %v786_v42  ;;  %v860_v19 = vand.u32 2147483647, %v2184_v48  ;;  %vm971_vm9 = vcmp.lt.f32.partialorder %v970_v28, 0.0004427343  ;;  %v801_v42 = vmax.f32 %v2160_v11, 0.0 }
 0x17a   :  { %v2189_v50 = vpop.eup %1510  ;;  %1520 = vlog2.f32 %v854_v0  ;;  %v2204_v58 = vsel %vm789_vm5, %v790_v1, %v788_v57  ;;  %v969_v30 = vmul.f32 %v1505_v44, %v968_v7  ;;  %v858_v24 = vadd.f32 1.0, %v857_v10 }
 0x17b   :  { %v845_v34 = vadd.f32 1.0, %v2189_v50  ;;  %v1513_v54 = vpop.eup %1512  ;;  %v848_v12 = vmul.f32 -0.5, %v2189_v50  ;;  %v941_v16 = vand.u32 2147483647, %v2204_v58  ;;  %v851_v26 = vand.u32 2147483647, %v2189_v50 }
 0x17c   :  { %v2197_v61 = vpop.eup %1514  ;;  %v838_v62 = vmul.f32 0.6931472, %v1513_v54  ;;  %v859_v47 = vmul.f32 %v2184_v48, %v858_v24  ;;  %vm861_vm11 = vcmp.lt.f32.partialorder %v860_v19, 0.0004427343  ;;  %v927_v0 = vmax.f32 %v2171_v15, 0.0 }
 0x17d   :  { %1522 = vlog2.f32 %v845_v34  ;;  %v1517_v4 = vpop.eup %1516  ;;  %v955_v6 = vadd.f32 1.0, %v2197_v61  ;;  %v958_v21 = vmul.f32 -0.5, %v2197_v61  ;;  %v945_v33 = vsub.f32 0.0, %v941_v16 }
 0x17e   :  { %v829_v3 = vmul.f32 0.6931472, %v1517_v4  ;;  %v844_v8 = vsel %vm843_vm6, %v841_v63, %v838_v62  ;;  %v849_v39 = vadd.f32 1.0, %v848_v12  ;;  %v961_v44 = vand.u32 2147483647, %v2197_v61 }
 0x17f   :  { %v864_v25 = vadd.f32 %v844_v8, %v800_v27  ;;  %1524 = vlog2.f32 %v955_v6  ;;  %v951_v36 = vmul.f32 1.442695, %v945_v33  ;;  %vm852_vm12 = vcmp.lt.f32.partialorder %v851_v26, 0.0004427343 }
 0x180   :  { %v835_v14 = vsel %vm834_vm7, %v832_v5, %v829_v3  ;;  %v850_v27 = vmul.f32 %v2189_v50, %v849_v39  ;;  %vm962_vm13 = vcmp.lt.f32.partialorder %v961_v44, 0.0004427343 }
 0x181   :  { %v863_v17 = vadd.f32 %v835_v14, %v799_v55  ;;  %v2214_v18 = vsel %vm804_vm3, %v2113_v41, %v864_v25  ;;  %v928_v41 = vmax.f32 %v2143_v2, 0.0 }
 0x182   :  { %v1519_v20 = vpop.eup %1518  ;;  %1526 = vrsqrt.f32 %v2214_v18  ;;  %vm880_vm1 = vcmp.eq.f32.partialorder %v2214_v18, inf  ;;  %v883_v62 = vand.u32 2147483648, %v2214_v18  ;;  %vm882_vm3 = vcmp.eq.f32.partialorder %v2214_v18, 0.0 }
 0x183   :  { %v2220_v29 = vsel %vm803_vm8, %v2122_v49, %v863_v17  ;;  %v966_v31 = vmul.f32 0.6931472, %v1519_v20  ;;  %1528 = vpow2.f32 %v953_v13  ;;  %v959_v49 = vadd.f32 1.0, %v958_v21 }
 0x184   :  { %1530 = vrsqrt.f32 %v2220_v29  ;;  %v1521_v35 = vpop.eup %1520  ;;  %vm873_vm4 = vcmp.eq.f32.partialorder %v2220_v29, inf  ;;  %vm875_vm5 = vcmp.eq.f32.partialorder %v2220_v29, 0.0 }
 0x185   :  { %v972_v22 = vsel %vm971_vm9, %v969_v30, %v966_v31  ;;  %v856_v37 = vmul.f32 0.6931472, %v1521_v35  ;;  %1532 = vpow2.f32 %v951_v36  ;;  %v960_v48 = vmul.f32 %v2197_v61, %v959_v49 }
 0x186   :  { %v992_v32 = vadd.f32 %v972_v22, %v928_v41 }
 0x187   :  { %v1523_v38 = vpop.eup %1522  ;;  %v862_v46 = vsel %vm861_vm11, %v859_v47, %v856_v37 }
 0x188   :  { %v847_v40 = vmul.f32 0.6931472, %v1523_v38  ;;  %v996_v45 = vsel %vm932_vm10, %v2143_v2, %v992_v32  ;;  %v866_v53 = vadd.f32 %v862_v46, %v802_v23 }
 0x189   :  { %v1525_v56 = vpop.eup %1524  ;;  %1534 = vrsqrt.f32 %v996_v45  ;;  %vm1008_vm6 = vcmp.eq.f32.partialorder %v996_v45, inf  ;;  %v1011_v25 = vand.u32 2147483648, %v996_v45  ;;  %vm1010_vm7 = vcmp.eq.f32.partialorder %v996_v45, 0.0 }
 0x18a   :  { %v957_v51 = vmul.f32 0.6931472, %v1525_v56  ;;  %v853_v52 = vsel %vm852_vm12, %v850_v27, %v847_v40  ;;  %v2240_v34 = vsel %vm806_vm15, %v2145_v9, %v866_v53 }
 0x18b   :  { %v865_v2 = vadd.f32 %v853_v52, %v801_v42  ;;  %1536 = vrsqrt.f32 %v2240_v34  ;;  %vm894_vm12 = vcmp.eq.f32.partialorder %v2240_v34, inf  ;;  %v897_v39 = vand.u32 2147483648, %v2240_v34 }
 0x18c   :  { %v1527_v55 = vpop.eup %1526  ;;  %v963_v50 = vsel %vm962_vm13, %v960_v48, %v957_v51  ;;  %v929_v48 = vmax.f32 %v2204_v58, 0.0 }
 0x18d   :  { %v2242_v54 = vpop.eup %1528  ;;  %v879_v59 = vmul.f32 %v1527_v55, %v2214_v18  ;;  %v991_v57 = vadd.f32 %v963_v50, %v927_v0  ;;  %v869_v60 = vsel %vm805_vm0, %v2160_v11, %v865_v2  ;;  %v876_v11 = vand.u32 2147483648, %v2220_v29 }
 0x18e   :  { %v1531_v61 = vpop.eup %1530  ;;  %1538 = vrsqrt.f32 %v869_v60  ;;  %v982_v7 = vadd.f32 1.0, %v2242_v54  ;;  %v985_v14 = vmul.f32 -0.5, %v2242_v54  ;;  %vm887_vm8 = vcmp.eq.f32.partialorder %v869_v60, inf }
 0x18f   :  { %v872_v9 = vmul.f32 %v1531_v61, %v2220_v29  ;;  %v881_v63 = vsel %vm880_vm1, %v2214_v18, %v879_v59  ;;  %v995_v1 = vsel %vm931_vm2, %v2171_v15, %v991_v57  ;;  %v2257_v5 = vpop.eup %1532  ;;  %vm889_vm9 = vcmp.eq.f32.partialorder %v869_v60, 0.0 }
 0x190   :  { %v884_v4 = vsel %vm882_vm3, %v883_v62, %v881_v63  ;;  %1540 = vrsqrt.f32 %v995_v1  ;;  %v973_v15 = vadd.f32 1.0, %v2257_v5  ;;  %v890_v16 = vand.u32 2147483648, %v869_v60 }
 0x191   :  { %v874_v6 = vsel %vm873_vm4, %v2220_v29, %v872_v9  ;;  %1542 = vrsqrt.f32 %v884_v4  ;;  %vm1001_vm10 = vcmp.eq.f32.partialorder %v995_v1, inf  ;;  %vm1003_vm11 = vcmp.eq.f32.partialorder %v995_v1, 0.0 }
 0x192   :  { %v877_v3 = vsel %vm875_vm5, %v876_v11, %v874_v6  ;;  %vm908_vm13 = vcmp.eq.f32.partialorder %v884_v4, inf  ;;  %v976_v20 = vmul.f32 -0.5, %v2257_v5  ;;  %vm910_vm15 = vcmp.eq.f32.partialorder %v884_v4, 0.0 }
 0x193   :  { %v1535_v8 = vpop.eup %1534  ;;  %1544 = vrsqrt.f32 %v877_v3  ;;  %v911_v30 = vand.u32 2147483648, %v884_v4  ;;  %v1004_v24 = vand.u32 2147483648, %v995_v1  ;;  %vm896_vm0 = vcmp.eq.f32.partialorder %v2240_v34, 0.0 }
 0x194   :  { %v1007_v10 = vmul.f32 %v1535_v8, %v996_v45  ;;  %1546 = vlog2.f32 %v982_v7  ;;  %vm901_vm1 = vcmp.eq.f32.partialorder %v877_v3, inf  ;;  %v979_v26 = vand.u32 2147483647, %v2257_v5 }
 0x195   :  { %1548 = vlog2.f32 %v973_v15  ;;  %v1537_v28 = vpop.eup %1536  ;;  %v977_v32 = vadd.f32 1.0, %v976_v20  ;;  %v986_v40 = vadd.f32 1.0, %v985_v14  ;;  %v904_v23 = vand.u32 2147483648, %v877_v3 }
 0x196   :  { %v1009_v13 = vsel %vm1008_vm6, %v996_v45, %v1007_v10  ;;  %v893_v19 = vmul.f32 %v1537_v28, %v2240_v34  ;;  %v988_v46 = vand.u32 2147483647, %v2242_v54  ;;  %vm903_vm2 = vcmp.eq.f32.partialorder %v877_v3, 0.0 }
 0x197   :  { %v2264_v12 = vsel %vm1010_vm7, %v1011_v25, %v1009_v13  ;;  %v978_v53 = vmul.f32 %v2257_v5, %v977_v32  ;;  %vm980_vm3 = vcmp.lt.f32.partialorder %v979_v26, 0.0004427343  ;;  %v987_v50 = vmul.f32 %v2242_v54, %v986_v40 }
 0x198   :  { %v1539_v17 = vpop.eup %1538  ;;  %1550 = vrsqrt.f32 %v2264_v12  ;;  %v895_v41 = vsel %vm894_vm12, %v2240_v34, %v893_v19  ;;  %v930_v34 = vmax.f32 %v2180_v43, 0.0  ;;  %vm989_vm4 = vcmp.lt.f32.partialorder %v988_v46, 0.0004427343 }
 0x199   :  { %v886_v18 = vmul.f32 %v1539_v17, %v869_v60  ;;  %v2279_v49 = vsel %vm896_vm0, %v897_v39, %v895_v41  ;;  %vm933_vm5 = vcmp.ne.f32.partialorder %v2204_v58, %v2204_v58  ;;  %vm934_vm6 = vcmp.ne.f32.partialorder %v2180_v43, %v2180_v43 }
 0x19a   :  { %v1541_v21 = vpop.eup %1540  ;;  %vm1036_vm7 = vcmp.eq.f32.partialorder %v2264_v12, inf  ;;  %v1039_v5 = vand.u32 2147483648, %v2264_v12  ;;  %v925_v13 = vand.u32 2147483648, %v2279_v49 }
 0x19b   :  { %v1543_v29 = vpop.eup %1542  ;;  %v1000_v31 = vmul.f32 %v1541_v21, %v995_v1  ;;  %v888_v33 = vsel %vm887_vm8, %v869_v60, %v886_v18  ;;  %vm1038_vm8 = vcmp.eq.f32.partialorder %v2264_v12, 0.0  ;;  %v1056_v21 = vld [vmem:[%s2335_s6 + $0x8] sm:$0xff] }
 0x19c   :  { %v907_v35 = vmul.f32 %v1543_v29, %v884_v4  ;;  %v2275_v22 = vsel %vm889_vm9, %v890_v16, %v888_v33 }
 0x19d   :  { %v1545_v36 = vpop.eup %1544  ;;  %v1002_v38 = vsel %vm1001_vm10, %v995_v1, %v1000_v31  ;;  %1552 = vrsqrt.f32 %v2275_v22  ;;  %vm915_vm9 = vcmp.eq.f32.partialorder %v2275_v22, inf  ;;  %vm917_vm10 = vcmp.eq.f32.partialorder %v2275_v22, 0.0 }
 0x19e   :  { %v900_v37 = vmul.f32 %v1545_v36, %v877_v3  ;;  %v909_v47 = vsel %vm908_vm13, %v884_v4, %v907_v35  ;;  %v1005_v44 = vsel %vm1003_vm11, %v1004_v24, %v1002_v38  ;;  %v1547_v45 = vpop.eup %1546  ;;  %v918_v7 = vand.u32 2147483648, %v2275_v22 }
 0x19f   :  { %v912_v27 = vsel %vm910_vm15, %v911_v30, %v909_v47  ;;  %1554 = vrsqrt.f32 %v1005_v44  ;;  %v1549_v56 = vpop.eup %1548  ;;  %v984_v55 = vmul.f32 0.6931472, %v1547_v45  ;;  %vm1029_vm11 = vcmp.eq.f32.partialorder %v1005_v44, inf  ;;  %v1058_v45 = vld [vmem:[%s2334_s7 + $0x8] sm:$0xff] }
 0x1a0   :  { %v902_v42 = vsel %vm901_vm1, %v877_v3, %v900_v37  ;;  %1556 = vrsqrt.f32 %v2279_v49  ;;  %v975_v52 = vmul.f32 0.6931472, %v1549_v56  ;;  %vm1031_vm12 = vcmp.eq.f32.partialorder %v1005_v44, 0.0 }
 0x1a1   :  { %v905_v51 = vsel %vm903_vm2, %v904_v23, %v902_v42  ;;  %v990_v60 = vsel %vm989_vm4, %v987_v50, %v984_v55  ;;  %v1032_v3 = vand.u32 2147483648, %v1005_v44  ;;  %vm922_vm13 = vcmp.eq.f32.partialorder %v2279_v49, inf }
 0x1a2   :  { %v1551_v0 = vpop.eup %1550  ;;  %v1361_v2 = vpack.c.bf16 %v912_v27, %v905_v51  ;;  %v981_v59 = vsel %vm980_vm3, %v978_v53, %v975_v52  ;;  %v994_v62 = vadd.f32 %v990_v60, %v930_v34  ;;  %vm924_vm15 = vcmp.eq.f32.partialorder %v2279_v49, 0.0  ;;  %v1232_v51 = vpop.permute.xlu0 %1231 }
 0x1a3   :  { %v1035_v57 = vmul.f32 %v1551_v0, %v2264_v12  ;;  %v993_v61 = vadd.f32 %v981_v59, %v929_v48  ;;  %v1227_v52 = vpop.permute.xlu1 %1226 }
 0x1a4   :  { %1362 = vmatprep.subr.bf16.mxu0 %v1361_v2  ;;  %v998_v63 = vsel %vm934_vm6, %v2180_v43, %v994_v62 }
 0x1a5   :  { %1364 = vmatpush3.bf16.msra.mxu0 %v1361_v2  ;;  %v997_v9 = vsel %vm933_vm5, %v2204_v58, %v993_v61  ;;  %v1037_v1 = vsel %vm1036_vm7, %v2264_v12, %v1035_v57  ;;  %vm1022_vm2 = vcmp.eq.f32.partialorder %v998_v63, inf  ;;  %v1025_v31 = vand.u32 2147483648, %v998_v63 }
 0x1a6   :  { %1558 = vrsqrt.f32 %v997_v9  ;;  %v1040_v8 = vsel %vm1038_vm8, %v1039_v5, %v1037_v1  ;;  %vm1015_vm0 = vcmp.eq.f32.partialorder %v997_v9, inf  ;;  %v1018_v30 = vand.u32 2147483648, %v997_v9 }
 0x1a7   :  { %v1553_v54 = vpop.eup %1552  ;;  %1560 = vrsqrt.f32 %v998_v63  ;;  %vm1017_vm1 = vcmp.eq.f32.partialorder %v997_v9, 0.0  ;;  %vm1024_vm3 = vcmp.eq.f32.partialorder %v998_v63, 0.0 }
 0x1a8   :  { %v914_v11 = vmul.f32 %v1553_v54, %v2275_v22 }
 0x1a9   :  { %v1555_v4 = vpop.eup %1554 }
 0x1aa   :  { %v1557_v58 = vpop.eup %1556  ;;  %v1028_v6 = vmul.f32 %v1555_v4, %v1005_v44  ;;  %v916_v43 = vsel %vm915_vm9, %v2275_v22, %v914_v11 }
 0x1ab   :  { %v921_v10 = vmul.f32 %v1557_v58, %v2279_v49  ;;  %v919_v25 = vsel %vm917_vm10, %v918_v7, %v916_v43 }
 0x1ac   :  { %v1030_v15 = vsel %vm1029_vm11, %v1005_v44, %v1028_v6 }
 0x1ad   :  { %v1033_v14 = vsel %vm1031_vm12, %v1032_v3, %v1030_v15  ;;  %v923_v28 = vsel %vm922_vm13, %v2279_v49, %v921_v10 }
 0x1ae   :  { %v1353_v12 = vpack.c.bf16 %v1040_v8, %v1033_v14  ;;  %v926_v16 = vsel %vm924_vm15, %v925_v13, %v923_v28 }
 0x1af   :  { %v1365_v17 = vpack.c.bf16 %v926_v16, %v919_v25 }
 0x1b0   :  { %1354 = vmatprep.subr.bf16.mxu1 %v1353_v12  ;;  %v1559_v18 = vpop.eup %1558 }
 0x1b1   :  { %1366 = vmatprep.subr.bf16.mxu0 %v1365_v17  ;;  %1356 = vmatpush3.bf16.msra.mxu1 %v1353_v12  ;;  %v1561_v19 = vpop.eup %1560  ;;  %v1014_v20 = vmul.f32 %v1559_v18, %v997_v9 }
 0x1b2   :  { %1368 = vmatpush3.bf16.msra.mxu0 %v1365_v17  ;;  %v1021_v24 = vmul.f32 %v1561_v19, %v998_v63 }
 0x1b3   :  { %v1016_v29 = vsel %vm1015_vm0, %v997_v9, %v1014_v20 }
 0x1b4   :  { %v1019_v33 = vsel %vm1017_vm1, %v1018_v30, %v1016_v29  ;;  %v1023_v41 = vsel %vm1022_vm2, %v998_v63, %v1021_v24 }
 0x1b5   :  { %1347 = vmatmul.mubr.msk.f32.vlgmr.msra.gmra.mrb[4].mxu0 %vm1059_vm14, %v1056_v21  ;;  %v1026_v39 = vsel %vm1024_vm3, %v1025_v31, %v1023_v41  ;;  %1562 = vrsqrt.f32 %v1019_v33  ;;  %vm1043_vm4 = vcmp.eq.f32.partialorder %v1019_v33, inf  ;;  %v1046_v36 = vand.u32 2147483648, %v1019_v33 }
 0x1b6   :  { %1564 = vrsqrt.f32 %v1026_v39  ;;  %vm1045_vm5 = vcmp.eq.f32.partialorder %v1019_v33, 0.0  ;;  %vm1050_vm6 = vcmp.eq.f32.partialorder %v1026_v39, inf  ;;  %v1053_v32 = vand.u32 2147483648, %v1026_v39 }
 0x1b7   :  { %vm1052_vm7 = vcmp.eq.f32.partialorder %v1026_v39, 0.0 }
 0x1bf   :  { %v1563_v35 = vpop.eup %1562 }
 0x1c0   :  { %v1565_v22 = vpop.eup %1564  ;;  %v1042_v26 = vmul.f32 %v1563_v35, %v1019_v33 }
 0x1c1   :  { %v1049_v38 = vmul.f32 %v1565_v22, %v1026_v39 }
 0x1c2   :  { %v1044_v49 = vsel %vm1043_vm4, %v1019_v33, %v1042_v26 }
 0x1c3   :  { %v1047_v37 = vsel %vm1045_vm5, %v1046_v36, %v1044_v49  ;;  %v1051_v47 = vsel %vm1050_vm6, %v1026_v39, %v1049_v38 }
 0x1c4   :  { %v1054_v44 = vsel %vm1052_vm7, %v1053_v32, %v1051_v47 }
 0x1c5   :  { %v1357_v40 = vpack.c.bf16 %v1054_v44, %v1047_v37 }
 0x1c7   :  { %1358 = vmatprep.subr.bf16.mxu1 %v1357_v40 }
 0x1c8   :  { %1360 = vmatpush3.bf16.msra.mxu1 %v1357_v40 }
 0x1cb   :  { %1336 = vmatmul.mubr.msk.f32.vlgmr.msra.gmra.mrb[4].mxu1 %vm1059_vm14, %v1058_v45 }
 0x288   :  { %v1348_v23 = vpop.f32.mrb[4].mxu0 }
 0x289   :  { %v1213_v27 = vpop.f32.mrb[5].mxu0 }
 0x29e   :  { %v1337_v46 = vpop.f32.mrb[4].mxu1 }
 0x29f   :  { %v1219_v56 = vadd.f32 %v1348_v23, %v1337_v46  ;;  %v1132_v42 = vpop.f32.mrb[5].mxu1 }
 0x2a0   :  { %v1214_v48 = vadd.f32 %v1213_v27, %v1132_v42 }
 0x2a1   :  { %v1235_v53 = vadd.f32 %v1232_v51, %v1219_v56 }
 0x2a2   :  { %v1234_v0 = vadd.f32 %v1227_v52, %v1214_v48 }
 0x2a3   :  { %v1240_v2 = vand.u32 2147483647, %v1235_v53  ;;  %v1237_v63 = vmax.f32 %v1235_v53, 0.0  ;;  %vm1238_vm8 = vcmp.ne.f32.partialorder %v1235_v53, %v1235_v53 }
 0x2a4   :  { %1236 = vst [vmem:[%s2336_s9] sm:$0xff] %v1234_v0 }
 0x2a5   :  { %v1241_v55 = vsub.f32 0.0, %v1240_v2 }
 0x2a7   :  { %v1242_v50 = vmul.f32 1.442695, %v1241_v55 }
 0x2a9   :  { %1566 = vpow2.f32 %v1242_v50 }
 0x2b3   :  { %v1567_v34 = vpop.eup %1566 }
 0x2b4   :  { %v1244_v59 = vadd.f32 1.0, %v1567_v34  ;;  %v1247_v57 = vmul.f32 -0.5, %v1567_v34  ;;  %v1250_v61 = vand.u32 2147483647, %v1567_v34 }
 0x2b6   :  { %1568 = vlog2.f32 %v1244_v59  ;;  %v1248_v60 = vadd.f32 1.0, %v1247_v57  ;;  %vm1251_vm14 = vcmp.lt.f32.partialorder %v1250_v61, 0.0004427343 }
 0x2b8   :  { %v1249_v54 = vmul.f32 %v1567_v34, %v1248_v60 }
 0x2c0   :  { %v1569_v62 = vpop.eup %1568 }
 0x2c1   :  { %v1246_v9 = vmul.f32 0.6931472, %v1569_v62 }
 0x2c3   :  { %v1252_v1 = vsel %vm1251_vm14, %v1249_v54, %v1246_v9 }
 0x2c4   :  { %v1253_v11 = vadd.f32 %v1252_v1, %v1237_v63 }
 0x2c6   :  { %v1254_v4 = vsel %vm1238_vm8, %v1235_v53, %v1253_v11 }
 0x2c7   :  { %1570 = vrsqrt.f32 %v1254_v4  ;;  %vm1257_vm9 = vcmp.eq.f32.partialorder %v1254_v4, inf  ;;  %v1260_v6 = vand.u32 2147483648, %v1254_v4  ;;  %vm1259_vm10 = vcmp.eq.f32.partialorder %v1254_v4, 0.0 }
 0x2d1   :  { %v1571_v5 = vpop.eup %1570 }
 0x2d2   :  { %v1256_v58 = vmul.f32 %v1571_v5, %v1254_v4 }
 0x2d4   :  { %v1258_v43 = vsel %vm1257_vm9, %v1254_v4, %v1256_v58 }
 0x2d5   :  { %v1261_v7 = vsel %vm1259_vm10, %v1260_v6, %v1258_v43 }
 0x2d6   :  { %1572 = vrsqrt.f32 %v1261_v7  ;;  %vm1264_vm11 = vcmp.eq.f32.partialorder %v1261_v7, inf  ;;  %v1267_v10 = vand.u32 2147483648, %v1261_v7  ;;  %vm1266_vm12 = vcmp.eq.f32.partialorder %v1261_v7, 0.0 }
 0x2e0   :  { %v1573_v3 = vpop.eup %1572 }
 0x2e1   :  { %v1263_v8 = vmul.f32 %v1573_v3, %v1261_v7 }
 0x2e3   :  { %v1265_v15 = vsel %vm1264_vm11, %v1261_v7, %v1263_v8 }
 0x2e4   :  { %v1268_v25 = vsel %vm1266_vm12, %v1267_v10, %v1265_v15 }
 0x2e5   :  { %1269 = vst [vmem:[%s2336_s9 + $0x8] sm:$0xff] %v1268_v25 }

</bundles_post_ra>
